<compile_context>
chip_gen: v5e
topology: v5e:2x2
jax: 0.10.0
libtpu: 0.0.40
codegen_flags: <defaults>
</compile_context>

<pallas_src>
import functools
import math

import jax
import jax.numpy as jnp
from jax import lax
from jax.experimental import pallas as pl
from jax.experimental.pallas import tpu as pltpu

F32 = jnp.float32
BF16 = jnp.bfloat16
VMEM_LIMIT = 48 * 1024 * 1024  # safe on v5e/v6e (128 MiB) and v7x (64 MiB)


def _row_tile(m):
    """Largest row tile <= 512 that divides m (falls back to m)."""
    for t in (512, 256, 128, 64, 32, 16, 8):
        if t <= m and m % t == 0:
            return t
    return m


# ----------------------------- linear (+ optional tanh) -----------------------------
def _linear_kernel(x_ref, w_ref, b_ref, o_ref, *, act):
    y = jnp.dot(x_ref[...].astype(w_ref.dtype), w_ref[...],
                preferred_element_type=jnp.float32) + b_ref[...]
    if act == "tanh":
        y = jnp.tanh(y)
    o_ref[...] = y


def linear(x, w, b, act="none"):
    m, k = x.shape
    n = w.shape[1]
    tm = _row_tile(m)
    cost = pl.CostEstimate(flops=2 * m * k * n, transcendentals=m * n,
                           bytes_accessed=4 * (m * k + m * n) + 2 * k * n)
    return pl.pallas_call(
        functools.partial(_linear_kernel, act=act),
        out_shape=jax.ShapeDtypeStruct((m, n), F32),
        grid=(m // tm,),
        in_specs=[
            pl.BlockSpec((tm, k), lambda i: (i, 0)),
            pl.BlockSpec((k, n), lambda i: (0, 0)),
            pl.BlockSpec((1, n), lambda i: (0, 0)),
        ],
        out_specs=pl.BlockSpec((tm, n), lambda i: (i, 0)),
        compiler_params=pltpu.CompilerParams(
            dimension_semantics=("parallel",), vmem_limit_bytes=VMEM_LIMIT),
        cost_estimate=cost,
    )(x, w.astype(BF16), b.reshape(1, n).astype(F32))


# ---------------- fused LayerNorm + delta/B/C projections (one HBM pass) ----------------
def _ln_proj_kernel(x_ref, g_ref, be_ref, wd_ref, bd_ref, wbc_ref, bbc_ref,
                    xn_ref, d_ref, bc_ref, *, eps):
    x = x_ref[...]
    mu = jnp.mean(x, axis=-1, keepdims=True)
    var = jnp.mean(jnp.square(x - mu), axis=-1, keepdims=True)
    xn = (x - mu) * lax.rsqrt(var + eps) * g_ref[...] + be_ref[...]
    xn_ref[...] = xn

    xb = xn.astype(wd_ref.dtype)
    zd = jnp.dot(xb, wd_ref[...], preferred_element_type=jnp.float32) + bd_ref[...]
    # numerically stable softplus (f32 elementwise)
    d_ref[...] = jnp.maximum(zd, 0.0) + jnp.log1p(jnp.exp(-jnp.abs(zd)))
    bc_ref[...] = jnp.dot(xb, wbc_ref[...], preferred_element_type=jnp.float32) + bbc_ref[...]


def ln_proj(x, g, be, wd, bd, wbc, bbc, eps=1e-5):
    m, h = x.shape
    n2 = wbc.shape[1]
    tm = _row_tile(m)
    cost = pl.CostEstimate(flops=2 * m * h * (h + n2), transcendentals=2 * m * h,
                           bytes_accessed=4 * (3 * m * h + m * n2) + 2 * h * (h + n2))
    out_shape = (
        jax.ShapeDtypeStruct((m, h), F32),    # xn (LayerNorm output, feeds the scan)
        jax.ShapeDtypeStruct((m, h), F32),    # delta = softplus(xn @ Wd + bd)
        jax.ShapeDtypeStruct((m, n2), F32),   # [B(t) | C(t)]
    )
    return pl.pallas_call(
        functools.partial(_ln_proj_kernel, eps=eps),
        out_shape=out_shape,
        grid=(m // tm,),
        in_specs=[
            pl.BlockSpec((tm, h), lambda i: (i, 0)),
            pl.BlockSpec((1, h), lambda i: (0, 0)),
            pl.BlockSpec((1, h), lambda i: (0, 0)),
            pl.BlockSpec((h, h), lambda i: (0, 0)),
            pl.BlockSpec((1, h), lambda i: (0, 0)),
            pl.BlockSpec((h, n2), lambda i: (0, 0)),
            pl.BlockSpec((1, n2), lambda i: (0, 0)),
        ],
        out_specs=[
            pl.BlockSpec((tm, h), lambda i: (i, 0)),
            pl.BlockSpec((tm, h), lambda i: (i, 0)),
            pl.BlockSpec((tm, n2), lambda i: (i, 0)),
        ],
        compiler_params=pltpu.CompilerParams(
            dimension_semantics=("parallel",), vmem_limit_bytes=VMEM_LIMIT),
        cost_estimate=cost,
    )(x, g.reshape(1, h), be.reshape(1, h),
      wd.astype(BF16), bd.reshape(1, h),
      wbc.astype(BF16), bbc.reshape(1, n2))


# ------------------------- fused GELU -> GLU -> residual add -------------------------
def _gelu_glu_res_kernel(x_ref, wa_ref, ba_ref, wb_ref, bb_ref, skip_ref, o_ref):
    x = x_ref[...]
    c = math.sqrt(2.0 / math.pi)
    g = 0.5 * x * (1.0 + jnp.tanh(c * (x + 0.044715 * x * x * x)))   # GELU (tanh approx)
    gb = g.astype(wa_ref.dtype)
    za = jnp.dot(gb, wa_ref[...], preferred_element_type=jnp.float32) + ba_ref[...]
    zb = jnp.dot(gb, wb_ref[...], preferred_element_type=jnp.float32) + bb_ref[...]
    o_ref[...] = za * (1.0 / (1.0 + jnp.exp(-zb))) + skip_ref[...]


def gelu_glu_res(x, wa, ba, wb, bb, skip):
    m, h = x.shape
    tm = _row_tile(m)
    cost = pl.CostEstimate(flops=4 * m * h * h, transcendentals=2 * m * h,
                           bytes_accessed=4 * (3 * m * h) + 4 * h * h)
    return pl.pallas_call(
        _gelu_glu_res_kernel,
        out_shape=jax.ShapeDtypeStruct((m, h), F32),
        grid=(m // tm,),
        in_specs=[
            pl.BlockSpec((tm, h), lambda i: (i, 0)),
            pl.BlockSpec((h, h), lambda i: (0, 0)),
            pl.BlockSpec((1, h), lambda i: (0, 0)),
            pl.BlockSpec((h, h), lambda i: (0, 0)),
            pl.BlockSpec((1, h), lambda i: (0, 0)),
            pl.BlockSpec((tm, h), lambda i: (i, 0)),
        ],
        out_specs=pl.BlockSpec((tm, h), lambda i: (i, 0)),
        compiler_params=pltpu.CompilerParams(
            dimension_semantics=("parallel",), vmem_limit_bytes=VMEM_LIMIT),
        cost_estimate=cost,
    )(x, wa.astype(BF16), ba.reshape(1, h), wb.astype(BF16), bb.reshape(1, h), skip)


# ---------------------------------- S6 selective scan ----------------------------------
def _s6_scan_kernel(delta_ref, x_ref, bt_ref, ct_ref, a_ref, dskip_ref, o_ref,
                    h_s, *, group):
    # delta_ref / x_ref / o_ref: [TL, H]   bt_ref / ct_ref: [TL/group, N, group]
    # a_ref: [N, H] (= A^T)   dskip_ref: [1, H]   h_s: VMEM scratch [N, H]
    @pl.when(pl.program_id(1) == 0)          # reset hidden state at chunk 0 of each batch
    def _():
        h_s[...] = jnp.zeros(h_s.shape, h_s.dtype)

    a = a_ref[...]                            # [N, H]
    dskip = dskip_ref[...]                    # [1, H]
    num_slabs = bt_ref.shape[0]

    def slab_step(s, h):
        t0 = pl.multiple_of(s * group, group)
        d8 = delta_ref[pl.ds(t0, group), :]   # [G, H]
        x8 = x_ref[pl.ds(t0, group), :]       # [G, H]
        dx8 = d8 * x8                         # [G, H]
        ys = []
        for t in range(group):                # 8 recurrent steps, statically unrolled
            da_t = jnp.exp(d8[t:t + 1, :] * a)            # [N, H]  (EUP)
            b_col = bt_ref[s, :, pl.ds(t, 1)]             # [N, 1]
            c_col = ct_ref[s, :, pl.ds(t, 1)]             # [N, 1]
            h = da_t * h + b_col * dx8[t:t + 1, :]        # [N, H]
            ys.append(jnp.sum(h * c_col, axis=0, keepdims=True))   # [1, H]
        # one dense [G, H] store per slab (D*x hoisted out of the per-step path)
        o_ref[pl.ds(t0, group), :] = jnp.concatenate(ys, axis=0) + dskip * x8
        return h

    h_s[...] = lax.fori_loop(0, num_slabs, slab_step, h_s[...])


def s6_scan(delta, x, bm, cm, a_t, d_skip):
    B, L, H = x.shape
    N = a_t.shape[0]
    tl = _row_tile(L)                 # sequence chunk per grid step (bounds VMEM)
    group = 8                         # sublane group (timesteps per dense store)
    while group > 1 and tl % group:
        group //= 2
    slabs = tl // group
    # Pre-pack B(t)/C(t) so N sits on the sublane axis: [B, L, N] -> [B, L/G, N, G]
    bm4 = bm.reshape(B, L // group, group, N).transpose(0, 1, 3, 2)
    cm4 = cm.reshape(B, L // group, group, N).transpose(0, 1, 3, 2)

    return pl.pallas_call(
        functools.partial(_s6_scan_kernel, group=group),
        out_shape=jax.ShapeDtypeStruct((B, L, H), F32),
        grid=(B, L // tl),
        in_specs=[
            pl.BlockSpec((None, tl, H), lambda b, c: (b, c, 0)),            # delta
            pl.BlockSpec((None, tl, H), lambda b, c: (b, c, 0)),            # x (post-LN)
            pl.BlockSpec((None, slabs, N, group), lambda b, c: (b, c, 0, 0)),  # B(t) packed
            pl.BlockSpec((None, slabs, N, group), lambda b, c: (b, c, 0, 0)),  # C(t) packed
            pl.BlockSpec((N, H), lambda b, c: (0, 0)),                      # A^T
            pl.BlockSpec((1, H), lambda b, c: (0, 0)),                      # D skip
        ],
        out_specs=pl.BlockSpec((None, tl, H), lambda b, c: (b, c, 0)),
        scratch_shapes=[pltpu.VMEM((N, H), F32)],                           # carried h
        compiler_params=pltpu.CompilerParams(
            dimension_semantics=("parallel", "arbitrary"),
            vmem_limit_bytes=VMEM_LIMIT),
    )(delta, x, bm4, cm4, a_t, d_skip)


# -------------------- classification head: mean -> linear -> softmax --------------------
def _decoder_cls_kernel(x_ref, w_ref, b_ref, o_ref):
    xm = jnp.mean(x_ref[...], axis=1)                                    # [TB, H]
    z = jnp.dot(xm.astype(w_ref.dtype), w_ref[...],
                preferred_element_type=jnp.float32) + b_ref[...]
    z = z - jnp.max(z, axis=-1, keepdims=True)
    e = jnp.exp(z)
    o_ref[...] = e / jnp.sum(e, axis=-1, keepdims=True)


def decoder_cls(x, w, b):
    B, L, H = x.shape
    o = w.shape[1]
    tb = _row_tile(B)
    return pl.pallas_call(
        _decoder_cls_kernel,
        out_shape=jax.ShapeDtypeStruct((B, o), F32),
        grid=(B // tb,),
        in_specs=[
            pl.BlockSpec((tb, L, H), lambda i: (i, 0, 0)),
            pl.BlockSpec((H, o), lambda i: (0, 0)),
            pl.BlockSpec((1, o), lambda i: (0, 0)),
        ],
        out_specs=pl.BlockSpec((tb, o), lambda i: (i, 0)),
        compiler_params=pltpu.CompilerParams(
            dimension_semantics=("parallel",), vmem_limit_bytes=VMEM_LIMIT),
    )(x, w.astype(BF16), b.reshape(1, o))


# --------------------------------------- parameters ---------------------------------------
def init_params(key, num_blocks, input_dim, output_dim, hidden_dim, state_dim):
    def lin(k, fan_in, fan_out):
        kw, kb = jax.random.split(k)
        lim = 1.0 / math.sqrt(fan_in)
        w = jax.random.uniform(kw, (fan_in, fan_out), F32, -lim, lim)
        b = jax.random.uniform(kb, (fan_out,), F32, -lim, lim)
        return w, b

    keys = jax.random.split(key, 2 + num_blocks)
    params = {}
    params["enc_w"], params["enc_b"] = lin(keys[0], input_dim, hidden_dim)
    params["dec_w"], params["dec_b"] = lin(keys[1], hidden_dim, output_dim)

    blocks = []
    for i in range(num_blocks):
        bk = jax.random.split(keys[2 + i], 4)
        blk = {}
        blk["ln_g"] = jnp.ones((hidden_dim,), F32)
        blk["ln_b"] = jnp.zeros((hidden_dim,), F32)
        blk["wd"], blk["bd"] = lin(bk[0], hidden_dim, hidden_dim)          # delta projection
        wB, bB = lin(bk[1], hidden_dim, state_dim)
        wC, bC = lin(bk[2], hidden_dim, state_dim)
        blk["w_bc"] = jnp.concatenate([wB, wC], axis=1)                    # fused B|C proj
        blk["b_bc"] = jnp.concatenate([bB, bC], axis=0)
        # A = -(1..state_dim) per hidden dim (A_log = log(1..N)); stored transposed [N, H]
        a = -jnp.tile(jnp.arange(1, state_dim + 1, dtype=F32)[None, :], (hidden_dim, 1))
        blk["A_T"] = a.T
        blk["D"] = jnp.ones((1, hidden_dim), F32)
        blk["glu_w"], blk["glu_b"] = lin(bk[3], hidden_dim, 2 * hidden_dim)  # GLU Linear(H,2H)
        blocks.append(blk)
    params["blocks"] = blocks
    return params


# ---------------------------------------- forward ----------------------------------------
def mamba_forward(params, x, *, classification=True, output_step=1):
    B, L, Din = x.shape
    H = params["enc_w"].shape[1]
    N = params["blocks"][0]["A_T"].shape[0]

    h2d = linear(x.reshape(B * L, Din), params["enc_w"], params["enc_b"])

    for blk in params["blocks"]:
        skip = h2d
        xn, delta, bc = ln_proj(h2d, blk["ln_g"], blk["ln_b"],
                                blk["wd"], blk["bd"], blk["w_bc"], blk["b_bc"])
        bm, cm = bc[:, :N], bc[:, N:]
        y3 = s6_scan(delta.reshape(B, L, H), xn.reshape(B, L, H),
                     bm.reshape(B, L, N), cm.reshape(B, L, N),
                     blk["A_T"], blk["D"])
        wa, wb = blk["glu_w"][:, :H], blk["glu_w"][:, H:]
        ba, bb = blk["glu_b"][:H], blk["glu_b"][H:]
        h2d = gelu_glu_res(y3.reshape(B * L, H), wa, ba, wb, bb, skip)

    h3 = h2d.reshape(B, L, H)
    if classification:
        return decoder_cls(h3, params["dec_w"], params["dec_b"])
    hs = h3[:, output_step - 1::output_step]
    Bs, Ls, _ = hs.shape
    out = linear(hs.reshape(Bs * Ls, H), params["dec_w"], params["dec_b"], act="tanh")
    return out.reshape(Bs, Ls, -1)


# ------------------------------------------ main ------------------------------------------
if __name__ == "__main__":
    B, L, DIN, DOUT, H, N, NUM_BLOCKS = 2, 8, 4, 4, 32, 8, 2

    key = jax.random.PRNGKey(0)
    kp, kx = jax.random.split(key)
    params = init_params(kp, NUM_BLOCKS, DIN, DOUT, H, N)
    x = jax.random.normal(kx, (B, L, DIN), F32)

    fwd = jax.jit(functools.partial(mamba_forward, classification=True))
    out = jax.block_until_ready(fwd(params, x))

    assert out.shape == (B, DOUT)
    assert bool(jnp.all(jnp.isfinite(out)))
    print("KERNEL_OK")
</pallas_src>

<mosaic_0001>
module attributes {stable_mosaic.version = 11 : i64} {
  func.func @_linear_kernel(%arg0: i32, %arg1: memref<16x4xf32, #tpu.memory_space<vmem>>, %arg2: memref<4x32xbf16, #tpu.memory_space<vmem>>, %arg3: memref<1x32xf32, #tpu.memory_space<vmem>>, %arg4: memref<16x32xf32, #tpu.memory_space<vmem>>) attributes {dimension_semantics = [#tpu.dimension_semantics<parallel>], iteration_bounds = array<i64: 1>, scalar_prefetch = 0 : i64, scratch_operands = 0 : i64, tpu.core_type = #tpu.core_type<tc>, window_params = [{transform_indices = @transform_0, window_bounds = array<i64: 16, 4>}, {pipeline_mode = #tpu.pipeline_mode<synchronous>, transform_indices = @transform_1, window_bounds = array<i64: 4, 32>}, {pipeline_mode = #tpu.pipeline_mode<synchronous>, transform_indices = @transform_2, window_bounds = array<i64: 1, 32>}, {transform_indices = @transform_3, window_bounds = array<i64: 16, 32>}]} {
    %c0 = arith.constant 0 : index
    %c0_0 = arith.constant 0 : index
    %0 = vector.load %arg1[%c0, %c0_0] : memref<16x4xf32, #tpu.memory_space<vmem>>, vector<16x4xf32>
    %1 = arith.truncf %0 : vector<16x4xf32> to vector<16x4xbf16>
    %c0_1 = arith.constant 0 : index
    %c0_2 = arith.constant 0 : index
    %2 = vector.load %arg2[%c0_1, %c0_2] : memref<4x32xbf16, #tpu.memory_space<vmem>>, vector<4x32xbf16>
    %cst = arith.constant dense<0.000000e+00> : vector<16x32xf32>
    %3 = tpu.matmul %1, %2, %cst {dimension_numbers = #tpu.dot_dimension_numbers<[1], [0], [0], [1], [0, 0, 1, 1], [], []>} : vector<16x4xbf16>, vector<4x32xbf16>, vector<16x32xf32> -> vector<16x32xf32>
    %c0_3 = arith.constant 0 : index
    %c0_4 = arith.constant 0 : index
    %4 = vector.load %arg3[%c0_3, %c0_4] : memref<1x32xf32, #tpu.memory_space<vmem>>, vector<1x32xf32>
    %5 = vector.broadcast %4 : vector<1x32xf32> to vector<16x32xf32>
    %6 = arith.addf %3, %5 : vector<16x32xf32>
    %c0_5 = arith.constant 0 : index
    %c0_6 = arith.constant 0 : index
    %7 = vector.load %arg4[%c0_5, %c0_6] : memref<16x32xf32, #tpu.memory_space<vmem>>, vector<16x32xf32>
    tpu.vector_store %arg4[%c0_5, %c0_6], %6 {strides = array<i32>} : memref<16x32xf32, #tpu.memory_space<vmem>>, vector<16x32xf32>,
    return
  }
  func.func @transform_0(%arg0: i32) -> (i32, i32) {
    %c0_i32 = arith.constant 0 : i32
    %c0_i32_0 = arith.constant 0 : i32
    return %arg0, %c0_i32 : i32, i32
  }
  func.func @transform_1(%arg0: i32) -> (i32, i32) {
    %c0_i32 = arith.constant 0 : i32
    %c0_i32_0 = arith.constant 0 : i32
    %c0_i32_1 = arith.constant 0 : i32
    return %c0_i32, %c0_i32_0 : i32, i32
  }
  func.func @transform_2(%arg0: i32) -> (i32, i32) {
    %c0_i32 = arith.constant 0 : i32
    %c0_i32_0 = arith.constant 0 : i32
    %c0_i32_1 = arith.constant 0 : i32
    return %c0_i32, %c0_i32_0 : i32, i32
  }
  func.func @transform_3(%arg0: i32) -> (i32, i32) {
    %c0_i32 = arith.constant 0 : i32
    %c0_i32_0 = arith.constant 0 : i32
    return %arg0, %c0_i32 : i32, i32
  }
}

module attributes {stable_mosaic.version = 11 : i64} {
  func.func @_s6_scan_kernel(%arg0: i32, %arg1: i32, %arg2: memref<1x8x32xf32, #tpu.memory_space<vmem>>, %arg3: memref<1x8x32xf32, #tpu.memory_space<vmem>>, %arg4: memref<1x1x8x8xf32, #tpu.memory_space<vmem>>, %arg5: memref<1x1x8x8xf32, #tpu.memory_space<vmem>>, %arg6: memref<8x32xf32, #tpu.memory_space<vmem>>, %arg7: memref<1x32xf32, #tpu.memory_space<vmem>>, %arg8: memref<1x8x32xf32, #tpu.memory_space<vmem>>, %arg9: memref<8x32xf32, #tpu.memory_space<vmem>>) attributes {dimension_semantics = [#tpu.dimension_semantics<parallel>, #tpu.dimension_semantics<arbitrary>], iteration_bounds = array<i64: 2, 1>, scalar_prefetch = 0 : i64, scratch_operands = 1 : i64, tpu.core_type = #tpu.core_type<tc>, window_params = [{transform_indices = @transform_0, window_bounds = array<i64: 1, 8, 32>}, {transform_indices = @transform_1, window_bounds = array<i64: 1, 8, 32>}, {transform_indices = @transform_2, window_bounds = array<i64: 1, 1, 8, 8>}, {transform_indices = @transform_3, window_bounds = array<i64: 1, 1, 8, 8>}, {pipeline_mode = #tpu.pipeline_mode<synchronous>, transform_indices = @transform_4, window_bounds = array<i64: 8, 32>}, {pipeline_mode = #tpu.pipeline_mode<synchronous>, transform_indices = @transform_5, window_bounds = array<i64: 1, 32>}, {transform_indices = @transform_6, window_bounds = array<i64: 1, 8, 32>}]} {
    %c0_i32 = arith.constant 0 : i32
    %0 = arith.cmpi eq, %arg1, %c0_i32 : i32
    %1 = arith.extui %0 : i1 to i32
    %c0_i32_0 = arith.constant 0 : i32
    %2 = arith.cmpi ne, %1, %c0_i32_0 : i32
    scf.if %2 {
      %cst_63 = arith.constant 0.000000e+00 : f32
      %184 = vector.broadcast %cst_63 : f32 to vector<8x32xf32>
      %c0_64 = arith.constant 0 : index
      %c0_65 = arith.constant 0 : index
      %185 = vector.load %arg9[%c0_64, %c0_65] : memref<8x32xf32, #tpu.memory_space<vmem>>, vector<8x32xf32>
      tpu.vector_store %arg9[%c0_64, %c0_65], %184 {strides = array<i32>} : memref<8x32xf32, #tpu.memory_space<vmem>>, vector<8x32xf32>,
    } else {
    }
    %c0 = arith.constant 0 : index
    %c0_1 = arith.constant 0 : index
    %3 = vector.load %arg6[%c0, %c0_1] : memref<8x32xf32, #tpu.memory_space<vmem>>, vector<8x32xf32>
    %c0_2 = arith.constant 0 : index
    %c0_3 = arith.constant 0 : index
    %4 = vector.load %arg7[%c0_2, %c0_3] : memref<1x32xf32, #tpu.memory_space<vmem>>, vector<1x32xf32>
    %c0_4 = arith.constant 0 : index
    %c0_5 = arith.constant 0 : index
    %5 = vector.load %arg9[%c0_4, %c0_5] : memref<8x32xf32, #tpu.memory_space<vmem>>, vector<8x32xf32>
    %c0_i32_6 = arith.constant 0 : i32
    %c8_i32 = arith.constant 8 : i32
    %6 = arith.muli %c0_i32_6, %c8_i32 : i32
    %7 = tpu.assume_multiple %6, 8 : i32
    %c0_7 = arith.constant 0 : index
    %8 = arith.index_cast %7 : i32 to index
    %c0_8 = arith.constant 0 : index
    %9 = vector.load %arg2[%c0_7, %8, %c0_8] : memref<1x8x32xf32, #tpu.memory_space<vmem>>, vector<1x8x32xf32>
    %10 = vector.shape_cast %9 : vector<1x8x32xf32> to vector<8x32xf32>
    %c0_9 = arith.constant 0 : index
    %11 = arith.index_cast %7 : i32 to index
    %c0_10 = arith.constant 0 : index
    %12 = vector.load %arg3[%c0_9, %11, %c0_10] : memref<1x8x32xf32, #tpu.memory_space<vmem>>, vector<1x8x32xf32>
    %13 = vector.shape_cast %12 : vector<1x8x32xf32> to vector<8x32xf32>
    %14 = arith.mulf %10, %13 : vector<8x32xf32>
    %15 = vector.extract_strided_slice %10 {offsets = [0, 0], sizes = [1, 32], strides = [1, 1]} : vector<8x32xf32> to vector<1x32xf32>
    %16 = vector.broadcast %15 : vector<1x32xf32> to vector<8x32xf32>
    %17 = arith.mulf %16, %3 : vector<8x32xf32>
    %18 = math.exp %17 : vector<8x32xf32>
    %c0_11 = arith.constant 0 : index
    %19 = arith.index_cast %c0_i32_6 : i32 to index
    %c0_12 = arith.constant 0 : index
    %c0_13 = arith.constant 0 : index
    %20 = vector.load %arg4[%c0_11, %19, %c0_12, %c0_13] : memref<1x1x8x8xf32, #tpu.memory_space<vmem>>, vector<1x1x8x1xf32>
    %21 = vector.shape_cast %20 : vector<1x1x8x1xf32> to vector<8x1xf32>
    %c0_14 = arith.constant 0 : index
    %22 = arith.index_cast %c0_i32_6 : i32 to index
    %c0_15 = arith.constant 0 : index
    %c0_16 = arith.constant 0 : index
    %23 = vector.load %arg5[%c0_14, %22, %c0_15, %c0_16] : memref<1x1x8x8xf32, #tpu.memory_space<vmem>>, vector<1x1x8x1xf32>
    %24 = vector.shape_cast %23 : vector<1x1x8x1xf32> to vector<8x1xf32>
    %25 = arith.mulf %18, %5 : vector<8x32xf32>
    %26 = vector.extract_strided_slice %14 {offsets = [0, 0], sizes = [1, 32], strides = [1, 1]} : vector<8x32xf32> to vector<1x32xf32>
    %27 = vector.broadcast %21 : vector<8x1xf32> to vector<8x32xf32>
    %28 = vector.broadcast %26 : vector<1x32xf32> to vector<8x32xf32>
    %29 = arith.mulf %27, %28 : vector<8x32xf32>
    %30 = arith.addf %25, %29 : vector<8x32xf32>
    %31 = vector.broadcast %24 : vector<8x1xf32> to vector<8x32xf32>
    %32 = arith.mulf %30, %31 : vector<8x32xf32>
    %cst = arith.constant dense<0.000000e+00> : vector<32xf32>
    %33 = vector.multi_reduction <add>, %32, %cst [0] : vector<8x32xf32> to vector<32xf32>
    %34 = vector.shape_cast %33 : vector<32xf32> to vector<1x32xf32>
    %35 = vector.extract_strided_slice %10 {offsets = [1, 0], sizes = [1, 32], strides = [1, 1]} : vector<8x32xf32> to vector<1x32xf32>
    %36 = vector.broadcast %35 : vector<1x32xf32> to vector<8x32xf32>
    %37 = arith.mulf %36, %3 : vector<8x32xf32>
    %38 = math.exp %37 : vector<8x32xf32>
    %c0_17 = arith.constant 0 : index
    %39 = arith.index_cast %c0_i32_6 : i32 to index
    %c0_18 = arith.constant 0 : index
    %c1 = arith.constant 1 : index
    %40 = vector.load %arg4[%c0_17, %39, %c0_18, %c1] : memref<1x1x8x8xf32, #tpu.memory_space<vmem>>, vector<1x1x8x1xf32>
    %41 = vector.shape_cast %40 : vector<1x1x8x1xf32> to vector<8x1xf32>
    %c0_19 = arith.constant 0 : index
    %42 = arith.index_cast %c0_i32_6 : i32 to index
    %c0_20 = arith.constant 0 : index
    %c1_21 = arith.constant 1 : index
    %43 = vector.load %arg5[%c0_19, %42, %c0_20, %c1_21] : memref<1x1x8x8xf32, #tpu.memory_space<vmem>>, vector<1x1x8x1xf32>
    %44 = vector.shape_cast %43 : vector<1x1x8x1xf32> to vector<8x1xf32>
    %45 = arith.mulf %38, %30 : vector<8x32xf32>
    %46 = vector.extract_strided_slice %14 {offsets = [1, 0], sizes = [1, 32], strides = [1, 1]} : vector<8x32xf32> to vector<1x32xf32>
    %47 = vector.broadcast %41 : vector<8x1xf32> to vector<8x32xf32>
    %48 = vector.broadcast %46 : vector<1x32xf32> to vector<8x32xf32>
    %49 = arith.mulf %47, %48 : vector<8x32xf32>
    %50 = arith.addf %45, %49 : vector<8x32xf32>
    %51 = vector.broadcast %44 : vector<8x1xf32> to vector<8x32xf32>
    %52 = arith.mulf %50, %51 : vector<8x32xf32>
    %cst_22 = arith.constant dense<0.000000e+00> : vector<32xf32>
    %53 = vector.multi_reduction <add>, %52, %cst_22 [0] : vector<8x32xf32> to vector<32xf32>
    %54 = vector.shape_cast %53 : vector<32xf32> to vector<1x32xf32>
    %55 = vector.extract_strided_slice %10 {offsets = [2, 0], sizes = [1, 32], strides = [1, 1]} : vector<8x32xf32> to vector<1x32xf32>
    %56 = vector.broadcast %55 : vector<1x32xf32> to vector<8x32xf32>
    %57 = arith.mulf %56, %3 : vector<8x32xf32>
    %58 = math.exp %57 : vector<8x32xf32>
    %c0_23 = arith.constant 0 : index
    %59 = arith.index_cast %c0_i32_6 : i32 to index
    %c0_24 = arith.constant 0 : index
    %c2 = arith.constant 2 : index
    %60 = vector.load %arg4[%c0_23, %59, %c0_24, %c2] : memref<1x1x8x8xf32, #tpu.memory_space<vmem>>, vector<1x1x8x1xf32>
    %61 = vector.shape_cast %60 : vector<1x1x8x1xf32> to vector<8x1xf32>
    %c0_25 = arith.constant 0 : index
    %62 = arith.index_cast %c0_i32_6 : i32 to index
    %c0_26 = arith.constant 0 : index
    %c2_27 = arith.constant 2 : index
    %63 = vector.load %arg5[%c0_25, %62, %c0_26, %c2_27] : memref<1x1x8x8xf32, #tpu.memory_space<vmem>>, vector<1x1x8x1xf32>
    %64 = vector.shape_cast %63 : vector<1x1x8x1xf32> to vector<8x1xf32>
    %65 = arith.mulf %58, %50 : vector<8x32xf32>
    %66 = vector.extract_strided_slice %14 {offsets = [2, 0], sizes = [1, 32], strides = [1, 1]} : vector<8x32xf32> to vector<1x32xf32>
    %67 = vector.broadcast %61 : vector<8x1xf32> to vector<8x32xf32>
    %68 = vector.broadcast %66 : vector<1x32xf32> to vector<8x32xf32>
    %69 = arith.mulf %67, %68 : vector<8x32xf32>
    %70 = arith.addf %65, %69 : vector<8x32xf32>
    %71 = vector.broadcast %64 : vector<8x1xf32> to vector<8x32xf32>
    %72 = arith.mulf %70, %71 : vector<8x32xf32>
    %cst_28 = arith.constant dense<0.000000e+00> : vector<32xf32>
    %73 = vector.multi_reduction <add>, %72, %cst_28 [0] : vector<8x32xf32> to vector<32xf32>
    %74 = vector.shape_cast %73 : vector<32xf32> to vector<1x32xf32>
    %75 = vector.extract_strided_slice %10 {offsets = [3, 0], sizes = [1, 32], strides = [1, 1]} : vector<8x32xf32> to vector<1x32xf32>
    %76 = vector.broadcast %75 : vector<1x32xf32> to vector<8x32xf32>
    %77 = arith.mulf %76, %3 : vector<8x32xf32>
    %78 = math.exp %77 : vector<8x32xf32>
    %c0_29 = arith.constant 0 : index
    %79 = arith.index_cast %c0_i32_6 : i32 to index
    %c0_30 = arith.constant 0 : index
    %c3 = arith.constant 3 : index
    %80 = vector.load %arg4[%c0_29, %79, %c0_30, %c3] : memref<1x1x8x8xf32, #tpu.memory_space<vmem>>, vector<1x1x8x1xf32>
    %81 = vector.shape_cast %80 : vector<1x1x8x1xf32> to vector<8x1xf32>
    %c0_31 = arith.constant 0 : index
    %82 = arith.index_cast %c0_i32_6 : i32 to index
    %c0_32 = arith.constant 0 : index
    %c3_33 = arith.constant 3 : index
    %83 = vector.load %arg5[%c0_31, %82, %c0_32, %c3_33] : memref<1x1x8x8xf32, #tpu.memory_space<vmem>>, vector<1x1x8x1xf32>
    %84 = vector.shape_cast %83 : vector<1x1x8x1xf32> to vector<8x1xf32>
    %85 = arith.mulf %78, %70 : vector<8x32xf32>
    %86 = vector.extract_strided_slice %14 {offsets = [3, 0], sizes = [1, 32], strides = [1, 1]} : vector<8x32xf32> to vector<1x32xf32>
    %87 = vector.broadcast %81 : vector<8x1xf32> to vector<8x32xf32>
    %88 = vector.broadcast %86 : vector<1x32xf32> to vector<8x32xf32>
    %89 = arith.mulf %87, %88 : vector<8x32xf32>
    %90 = arith.addf %85, %89 : vector<8x32xf32>
    %91 = vector.broadcast %84 : vector<8x1xf32> to vector<8x32xf32>
    %92 = arith.mulf %90, %91 : vector<8x32xf32>
    %cst_34 = arith.constant dense<0.000000e+00> : vector<32xf32>
    %93 = vector.multi_reduction <add>, %92, %cst_34 [0] : vector<8x32xf32> to vector<32xf32>
    %94 = vector.shape_cast %93 : vector<32xf32> to vector<1x32xf32>
    %95 = vector.extract_strided_slice %10 {offsets = [4, 0], sizes = [1, 32], strides = [1, 1]} : vector<8x32xf32> to vector<1x32xf32>
    %96 = vector.broadcast %95 : vector<1x32xf32> to vector<8x32xf32>
    %97 = arith.mulf %96, %3 : vector<8x32xf32>
    %98 = math.exp %97 : vector<8x32xf32>
    %c0_35 = arith.constant 0 : index
    %99 = arith.index_cast %c0_i32_6 : i32 to index
    %c0_36 = arith.constant 0 : index
    %c4 = arith.constant 4 : index
    %100 = vector.load %arg4[%c0_35, %99, %c0_36, %c4] : memref<1x1x8x8xf32, #tpu.memory_space<vmem>>, vector<1x1x8x1xf32>
    %101 = vector.shape_cast %100 : vector<1x1x8x1xf32> to vector<8x1xf32>
    %c0_37 = arith.constant 0 : index
    %102 = arith.index_cast %c0_i32_6 : i32 to index
    %c0_38 = arith.constant 0 : index
    %c4_39 = arith.constant 4 : index
    %103 = vector.load %arg5[%c0_37, %102, %c0_38, %c4_39] : memref<1x1x8x8xf32, #tpu.memory_space<vmem>>, vector<1x1x8x1xf32>
    %104 = vector.shape_cast %103 : vector<1x1x8x1xf32> to vector<8x1xf32>
    %105 = arith.mulf %98, %90 : vector<8x32xf32>
    %106 = vector.extract_strided_slice %14 {offsets = [4, 0], sizes = [1, 32], strides = [1, 1]} : vector<8x32xf32> to vector<1x32xf32>
    %107 = vector.broadcast %101 : vector<8x1xf32> to vector<8x32xf32>
    %108 = vector.broadcast %106 : vector<1x32xf32> to vector<8x32xf32>
    %109 = arith.mulf %107, %108 : vector<8x32xf32>
    %110 = arith.addf %105, %109 : vector<8x32xf32>
    %111 = vector.broadcast %104 : vector<8x1xf32> to vector<8x32xf32>
    %112 = arith.mulf %110, %111 : vector<8x32xf32>
    %cst_40 = arith.constant dense<0.000000e+00> : vector<32xf32>
    %113 = vector.multi_reduction <add>, %112, %cst_40 [0] : vector<8x32xf32> to vector<32xf32>
    %114 = vector.shape_cast %113 : vector<32xf32> to vector<1x32xf32>
    %115 = vector.extract_strided_slice %10 {offsets = [5, 0], sizes = [1, 32], strides = [1, 1]} : vector<8x32xf32> to vector<1x32xf32>
    %116 = vector.broadcast %115 : vector<1x32xf32> to vector<8x32xf32>
    %117 = arith.mulf %116, %3 : vector<8x32xf32>
    %118 = math.exp %117 : vector<8x32xf32>
    %c0_41 = arith.constant 0 : index
    %119 = arith.index_cast %c0_i32_6 : i32 to index
    %c0_42 = arith.constant 0 : index
    %c5 = arith.constant 5 : index
    %120 = vector.load %arg4[%c0_41, %119, %c0_42, %c5] : memref<1x1x8x8xf32, #tpu.memory_space<vmem>>, vector<1x1x8x1xf32>
    %121 = vector.shape_cast %120 : vector<1x1x8x1xf32> to vector<8x1xf32>
    %c0_43 = arith.constant 0 : index
    %122 = arith.index_cast %c0_i32_6 : i32 to index
    %c0_44 = arith.constant 0 : index
    %c5_45 = arith.constant 5 : index
    %123 = vector.load %arg5[%c0_43, %122, %c0_44, %c5_45] : memref<1x1x8x8xf32, #tpu.memory_space<vmem>>, vector<1x1x8x1xf32>
    %124 = vector.shape_cast %123 : vector<1x1x8x1xf32> to vector<8x1xf32>
    %125 = arith.mulf %118, %110 : vector<8x32xf32>
    %126 = vector.extract_strided_slice %14 {offsets = [5, 0], sizes = [1, 32], strides = [1, 1]} : vector<8x32xf32> to vector<1x32xf32>
    %127 = vector.broadcast %121 : vector<8x1xf32> to vector<8x32xf32>
    %128 = vector.broadcast %126 : vector<1x32xf32> to vector<8x32xf32>
    %129 = arith.mulf %127, %128 : vector<8x32xf32>
    %130 = arith.addf %125, %129 : vector<8x32xf32>
    %131 = vector.broadcast %124 : vector<8x1xf32> to vector<8x32xf32>
    %132 = arith.mulf %130, %131 : vector<8x32xf32>
    %cst_46 = arith.constant dense<0.000000e+00> : vector<32xf32>
    %133 = vector.multi_reduction <add>, %132, %cst_46 [0] : vector<8x32xf32> to vector<32xf32>
    %134 = vector.shape_cast %133 : vector<32xf32> to vector<1x32xf32>
    %135 = vector.extract_strided_slice %10 {offsets = [6, 0], sizes = [1, 32], strides = [1, 1]} : vector<8x32xf32> to vector<1x32xf32>
    %136 = vector.broadcast %135 : vector<1x32xf32> to vector<8x32xf32>
    %137 = arith.mulf %136, %3 : vector<8x32xf32>
    %138 = math.exp %137 : vector<8x32xf32>
    %c0_47 = arith.constant 0 : index
    %139 = arith.index_cast %c0_i32_6 : i32 to index
    %c0_48 = arith.constant 0 : index
    %c6 = arith.constant 6 : index
    %140 = vector.load %arg4[%c0_47, %139, %c0_48, %c6] : memref<1x1x8x8xf32, #tpu.memory_space<vmem>>, vector<1x1x8x1xf32>
    %141 = vector.shape_cast %140 : vector<1x1x8x1xf32> to vector<8x1xf32>
    %c0_49 = arith.constant 0 : index
    %142 = arith.index_cast %c0_i32_6 : i32 to index
    %c0_50 = arith.constant 0 : index
    %c6_51 = arith.constant 6 : index
    %143 = vector.load %arg5[%c0_49, %142, %c0_50, %c6_51] : memref<1x1x8x8xf32, #tpu.memory_space<vmem>>, vector<1x1x8x1xf32>
    %144 = vector.shape_cast %143 : vector<1x1x8x1xf32> to vector<8x1xf32>
    %145 = arith.mulf %138, %130 : vector<8x32xf32>
    %146 = vector.extract_strided_slice %14 {offsets = [6, 0], sizes = [1, 32], strides = [1, 1]} : vector<8x32xf32> to vector<1x32xf32>
    %147 = vector.broadcast %141 : vector<8x1xf32> to vector<8x32xf32>
    %148 = vector.broadcast %146 : vector<1x32xf32> to vector<8x32xf32>
    %149 = arith.mulf %147, %148 : vector<8x32xf32>
    %150 = arith.addf %145, %149 : vector<8x32xf32>
    %151 = vector.broadcast %144 : vector<8x1xf32> to vector<8x32xf32>
    %152 = arith.mulf %150, %151 : vector<8x32xf32>
    %cst_52 = arith.constant dense<0.000000e+00> : vector<32xf32>
    %153 = vector.multi_reduction <add>, %152, %cst_52 [0] : vector<8x32xf32> to vector<32xf32>
    %154 = vector.shape_cast %153 : vector<32xf32> to vector<1x32xf32>
    %155 = vector.extract_strided_slice %10 {offsets = [7, 0], sizes = [1, 32], strides = [1, 1]} : vector<8x32xf32> to vector<1x32xf32>
    %156 = vector.broadcast %155 : vector<1x32xf32> to vector<8x32xf32>
    %157 = arith.mulf %156, %3 : vector<8x32xf32>
    %158 = math.exp %157 : vector<8x32xf32>
    %c0_53 = arith.constant 0 : index
    %159 = arith.index_cast %c0_i32_6 : i32 to index
    %c0_54 = arith.constant 0 : index
    %c7 = arith.constant 7 : index
    %160 = vector.load %arg4[%c0_53, %159, %c0_54, %c7] : memref<1x1x8x8xf32, #tpu.memory_space<vmem>>, vector<1x1x8x1xf32>
    %161 = vector.shape_cast %160 : vector<1x1x8x1xf32> to vector<8x1xf32>
    %c0_55 = arith.constant 0 : index
    %162 = arith.index_cast %c0_i32_6 : i32 to index
    %c0_56 = arith.constant 0 : index
    %c7_57 = arith.constant 7 : index
    %163 = vector.load %arg5[%c0_55, %162, %c0_56, %c7_57] : memref<1x1x8x8xf32, #tpu.memory_space<vmem>>, vector<1x1x8x1xf32>
    %164 = vector.shape_cast %163 : vector<1x1x8x1xf32> to vector<8x1xf32>
    %165 = arith.mulf %158, %150 : vector<8x32xf32>
    %166 = vector.extract_strided_slice %14 {offsets = [7, 0], sizes = [1, 32], strides = [1, 1]} : vector<8x32xf32> to vector<1x32xf32>
    %167 = vector.broadcast %161 : vector<8x1xf32> to vector<8x32xf32>
    %168 = vector.broadcast %166 : vector<1x32xf32> to vector<8x32xf32>
    %169 = arith.mulf %167, %168 : vector<8x32xf32>
    %170 = arith.addf %165, %169 : vector<8x32xf32>
    %171 = vector.broadcast %164 : vector<8x1xf32> to vector<8x32xf32>
    %172 = arith.mulf %170, %171 : vector<8x32xf32>
    %cst_58 = arith.constant dense<0.000000e+00> : vector<32xf32>
    %173 = vector.multi_reduction <add>, %172, %cst_58 [0] : vector<8x32xf32> to vector<32xf32>
    %174 = vector.shape_cast %173 : vector<32xf32> to vector<1x32xf32>
    %175 = tpu.concatenate %34, %54, %74, %94, %114, %134, %154, %174 in 0 : vector<1x32xf32>, vector<1x32xf32>, vector<1x32xf32>, vector<1x32xf32>, vector<1x32xf32>, vector<1x32xf32>, vector<1x32xf32>, vector<1x32xf32> -> vector<8x32xf32>
    %176 = vector.broadcast %4 : vector<1x32xf32> to vector<8x32xf32>
    %177 = arith.mulf %176, %13 : vector<8x32xf32>
    %178 = arith.addf %175, %177 : vector<8x32xf32>
    %c0_59 = arith.constant 0 : index
    %179 = arith.index_cast %7 : i32 to index
    %c0_60 = arith.constant 0 : index
    %180 = vector.load %arg8[%c0_59, %179, %c0_60] : memref<1x8x32xf32, #tpu.memory_space<vmem>>, vector<1x8x32xf32>
    %181 = vector.shape_cast %180 : vector<1x8x32xf32> to vector<8x32xf32>
    %182 = vector.shape_cast %178 : vector<8x32xf32> to vector<1x8x32xf32>
    tpu.vector_store %arg8[%c0_59, %179, %c0_60], %182 {strides = array<i32>} : memref<1x8x32xf32, #tpu.memory_space<vmem>>, vector<1x8x32xf32>,
    %c1_i32 = arith.constant 1 : i32
    %c0_61 = arith.constant 0 : index
    %c0_62 = arith.constant 0 : index
    %183 = vector.load %arg9[%c0_61, %c0_62] : memref<8x32xf32, #tpu.memory_space<vmem>>, vector<8x32xf32>
    tpu.vector_store %arg9[%c0_61, %c0_62], %170 {strides = array<i32>} : memref<8x32xf32, #tpu.memory_space<vmem>>, vector<8x32xf32>,
    return
  }
  func.func @transform_0(%arg0: i32, %arg1: i32) -> (i32, i32, i32) {
    %c0_i32 = arith.constant 0 : i32
    %c0_i32_0 = arith.constant 0 : i32
    return %arg0, %arg1, %c0_i32 : i32, i32, i32
  }
  func.func @transform_1(%arg0: i32, %arg1: i32) -> (i32, i32, i32) {
    %c0_i32 = arith.constant 0 : i32
    %c0_i32_0 = arith.constant 0 : i32
    return %arg0, %arg1, %c0_i32 : i32, i32, i32
  }
  func.func @transform_2(%arg0: i32, %arg1: i32) -> (i32, i32, i32, i32) {
    %c0_i32 = arith.constant 0 : i32
    %c0_i32_0 = arith.constant 0 : i32
    %c0_i32_1 = arith.constant 0 : i32
    return %arg0, %arg1, %c0_i32, %c0_i32_0 : i32, i32, i32, i32
  }
  func.func @transform_3(%arg0: i32, %arg1: i32) -> (i32, i32, i32, i32) {
    %c0_i32 = arith.constant 0 : i32
    %c0_i32_0 = arith.constant 0 : i32
    %c0_i32_1 = arith.constant 0 : i32
    return %arg0, %arg1, %c0_i32, %c0_i32_0 : i32, i32, i32, i32
  }
  func.func @transform_4(%arg0: i32, %arg1: i32) -> (i32, i32) {
    %c0_i32 = arith.constant 0 : i32
    %c0_i32_0 = arith.constant 0 : i32
    %c0_i32_1 = arith.constant 0 : i32
    return %c0_i32, %c0_i32_0 : i32, i32
  }
  func.func @transform_5(%arg0: i32, %arg1: i32) -> (i32, i32) {
    %c0_i32 = arith.constant 0 : i32
    %c0_i32_0 = arith.constant 0 : i32
    %c0_i32_1 = arith.constant 0 : i32
    return %c0_i32, %c0_i32_0 : i32, i32
  }
  func.func @transform_6(%arg0: i32, %arg1: i32) -> (i32, i32, i32) {
    %c0_i32 = arith.constant 0 : i32
    %c0_i32_0 = arith.constant 0 : i32
    return %arg0, %arg1, %c0_i32 : i32, i32, i32
  }
}

module attributes {stable_mosaic.version = 11 : i64} {
  func.func @_ln_proj_kernel(%arg0: i32, %arg1: memref<16x32xf32, #tpu.memory_space<vmem>>, %arg2: memref<1x32xf32, #tpu.memory_space<vmem>>, %arg3: memref<1x32xf32, #tpu.memory_space<vmem>>, %arg4: memref<32x32xbf16, #tpu.memory_space<vmem>>, %arg5: memref<1x32xf32, #tpu.memory_space<vmem>>, %arg6: memref<32x16xbf16, #tpu.memory_space<vmem>>, %arg7: memref<1x16xf32, #tpu.memory_space<vmem>>, %arg8: memref<16x32xf32, #tpu.memory_space<vmem>>, %arg9: memref<16x32xf32, #tpu.memory_space<vmem>>, %arg10: memref<16x16xf32, #tpu.memory_space<vmem>>) attributes {dimension_semantics = [#tpu.dimension_semantics<parallel>], iteration_bounds = array<i64: 1>, scalar_prefetch = 0 : i64, scratch_operands = 0 : i64, tpu.core_type = #tpu.core_type<tc>, window_params = [{transform_indices = @transform_0, window_bounds = array<i64: 16, 32>}, {pipeline_mode = #tpu.pipeline_mode<synchronous>, transform_indices = @transform_1, window_bounds = array<i64: 1, 32>}, {pipeline_mode = #tpu.pipeline_mode<synchronous>, transform_indices = @transform_2, window_bounds = array<i64: 1, 32>}, {pipeline_mode = #tpu.pipeline_mode<synchronous>, transform_indices = @transform_3, window_bounds = array<i64: 32, 32>}, {pipeline_mode = #tpu.pipeline_mode<synchronous>, transform_indices = @transform_4, window_bounds = array<i64: 1, 32>}, {pipeline_mode = #tpu.pipeline_mode<synchronous>, transform_indices = @transform_5, window_bounds = array<i64: 32, 16>}, {pipeline_mode = #tpu.pipeline_mode<synchronous>, transform_indices = @transform_6, window_bounds = array<i64: 1, 16>}, {transform_indices = @transform_7, window_bounds = array<i64: 16, 32>}, {transform_indices = @transform_8, window_bounds = array<i64: 16, 32>}, {transform_indices = @transform_9, window_bounds = array<i64: 16, 16>}]} {
    %c0 = arith.constant 0 : index
    %c0_0 = arith.constant 0 : index
    %0 = vector.load %arg1[%c0, %c0_0] : memref<16x32xf32, #tpu.memory_space<vmem>>, vector<16x32xf32>
    %cst = arith.constant dense<0.000000e+00> : vector<16xf32>
    %1 = vector.multi_reduction <add>, %0, %cst [1] : vector<16x32xf32> to vector<16xf32>
    %2 = vector.shape_cast %1 : vector<16xf32> to vector<16x1xf32>
    %cst_1 = arith.constant 3.200000e+01 : f32
    %3 = vector.broadcast %cst_1 : f32 to vector<16x1xf32>
    %4 = arith.divf %2, %3 : vector<16x1xf32>
    %5 = vector.broadcast %4 : vector<16x1xf32> to vector<16x32xf32>
    %6 = arith.subf %0, %5 : vector<16x32xf32>
    %7 = arith.mulf %6, %6 : vector<16x32xf32>
    %cst_2 = arith.constant dense<0.000000e+00> : vector<16xf32>
    %8 = vector.multi_reduction <add>, %7, %cst_2 [1] : vector<16x32xf32> to vector<16xf32>
    %9 = vector.shape_cast %8 : vector<16xf32> to vector<16x1xf32>
    %cst_3 = arith.constant 3.200000e+01 : f32
    %10 = vector.broadcast %cst_3 : f32 to vector<16x1xf32>
    %11 = arith.divf %9, %10 : vector<16x1xf32>
    %12 = vector.broadcast %4 : vector<16x1xf32> to vector<16x32xf32>
    %13 = arith.subf %0, %12 : vector<16x32xf32>
    %cst_4 = arith.constant 9.99999974E-6 : f32
    %14 = vector.broadcast %cst_4 : f32 to vector<16x1xf32>
    %15 = arith.addf %11, %14 : vector<16x1xf32>
    %16 = math.rsqrt %15 : vector<16x1xf32>
    %17 = vector.broadcast %16 : vector<16x1xf32> to vector<16x32xf32>
    %18 = arith.mulf %13, %17 : vector<16x32xf32>
    %c0_5 = arith.constant 0 : index
    %c0_6 = arith.constant 0 : index
    %19 = vector.load %arg2[%c0_5, %c0_6] : memref<1x32xf32, #tpu.memory_space<vmem>>, vector<1x32xf32>
    %20 = vector.broadcast %19 : vector<1x32xf32> to vector<16x32xf32>
    %21 = arith.mulf %18, %20 : vector<16x32xf32>
    %c0_7 = arith.constant 0 : index
    %c0_8 = arith.constant 0 : index
    %22 = vector.load %arg3[%c0_7, %c0_8] : memref<1x32xf32, #tpu.memory_space<vmem>>, vector<1x32xf32>
    %23 = vector.broadcast %22 : vector<1x32xf32> to vector<16x32xf32>
    %24 = arith.addf %21, %23 : vector<16x32xf32>
    %c0_9 = arith.constant 0 : index
    %c0_10 = arith.constant 0 : index
    %25 = vector.load %arg8[%c0_9, %c0_10] : memref<16x32xf32, #tpu.memory_space<vmem>>, vector<16x32xf32>
    tpu.vector_store %arg8[%c0_9, %c0_10], %24 {strides = array<i32>} : memref<16x32xf32, #tpu.memory_space<vmem>>, vector<16x32xf32>,
    %26 = arith.truncf %24 : vector<16x32xf32> to vector<16x32xbf16>
    %c0_11 = arith.constant 0 : index
    %c0_12 = arith.constant 0 : index
    %27 = vector.load %arg4[%c0_11, %c0_12] : memref<32x32xbf16, #tpu.memory_space<vmem>>, vector<32x32xbf16>
    %cst_13 = arith.constant dense<0.000000e+00> : vector<16x32xf32>
    %28 = tpu.matmul %26, %27, %cst_13 {dimension_numbers = #tpu.dot_dimension_numbers<[1], [0], [0], [1], [0, 0, 1, 1], [], []>} : vector<16x32xbf16>, vector<32x32xbf16>, vector<16x32xf32> -> vector<16x32xf32>
    %c0_14 = arith.constant 0 : index
    %c0_15 = arith.constant 0 : index
    %29 = vector.load %arg5[%c0_14, %c0_15] : memref<1x32xf32, #tpu.memory_space<vmem>>, vector<1x32xf32>
    %30 = vector.broadcast %29 : vector<1x32xf32> to vector<16x32xf32>
    %31 = arith.addf %28, %30 : vector<16x32xf32>
    %cst_16 = arith.constant 0.000000e+00 : f32
    %32 = vector.broadcast %cst_16 : f32 to vector<16x32xf32>
    %33 = arith.maximumf %31, %32 : vector<16x32xf32>
    %34 = math.absf %31 : vector<16x32xf32>
    %cst_17 = arith.constant 0.000000e+00 : f32
    %35 = vector.broadcast %cst_17 : f32 to vector<16x32xf32>
    %36 = arith.subf %35, %34 : vector<16x32xf32>
    %37 = math.exp %36 : vector<16x32xf32>
    %38 = math.log1p %37 : vector<16x32xf32>
    %39 = arith.addf %33, %38 : vector<16x32xf32>
    %c0_18 = arith.constant 0 : index
    %c0_19 = arith.constant 0 : index
    %40 = vector.load %arg9[%c0_18, %c0_19] : memref<16x32xf32, #tpu.memory_space<vmem>>, vector<16x32xf32>
    tpu.vector_store %arg9[%c0_18, %c0_19], %39 {strides = array<i32>} : memref<16x32xf32, #tpu.memory_space<vmem>>, vector<16x32xf32>,
    %c0_20 = arith.constant 0 : index
    %c0_21 = arith.constant 0 : index
    %41 = vector.load %arg6[%c0_20, %c0_21] : memref<32x16xbf16, #tpu.memory_space<vmem>>, vector<32x16xbf16>
    %cst_22 = arith.constant dense<0.000000e+00> : vector<16x16xf32>
    %42 = tpu.matmul %26, %41, %cst_22 {dimension_numbers = #tpu.dot_dimension_numbers<[1], [0], [0], [1], [0, 0, 1, 1], [], []>} : vector<16x32xbf16>, vector<32x16xbf16>, vector<16x16xf32> -> vector<16x16xf32>
    %c0_23 = arith.constant 0 : index
    %c0_24 = arith.constant 0 : index
    %43 = vector.load %arg7[%c0_23, %c0_24] : memref<1x16xf32, #tpu.memory_space<vmem>>, vector<1x16xf32>
    %44 = vector.broadcast %43 : vector<1x16xf32> to vector<16x16xf32>
    %45 = arith.addf %42, %44 : vector<16x16xf32>
    %c0_25 = arith.constant 0 : index
    %c0_26 = arith.constant 0 : index
    %46 = vector.load %arg10[%c0_25, %c0_26] : memref<16x16xf32, #tpu.memory_space<vmem>>, vector<16x16xf32>
    tpu.vector_store %arg10[%c0_25, %c0_26], %45 {strides = array<i32>} : memref<16x16xf32, #tpu.memory_space<vmem>>, vector<16x16xf32>,
    return
  }
  func.func @transform_0(%arg0: i32) -> (i32, i32) {
    %c0_i32 = arith.constant 0 : i32
    %c0_i32_0 = arith.constant 0 : i32
    return %arg0, %c0_i32 : i32, i32
  }
  func.func @transform_1(%arg0: i32) -> (i32, i32) {
    %c0_i32 = arith.constant 0 : i32
    %c0_i32_0 = arith.constant 0 : i32
    %c0_i32_1 = arith.constant 0 : i32
    return %c0_i32, %c0_i32_0 : i32, i32
  }
  func.func @transform_2(%arg0: i32) -> (i32, i32) {
    %c0_i32 = arith.constant 0 : i32
    %c0_i32_0 = arith.constant 0 : i32
    %c0_i32_1 = arith.constant 0 : i32
    return %c0_i32, %c0_i32_0 : i32, i32
  }
  func.func @transform_3(%arg0: i32) -> (i32, i32) {
    %c0_i32 = arith.constant 0 : i32
    %c0_i32_0 = arith.constant 0 : i32
    %c0_i32_1 = arith.constant 0 : i32
    return %c0_i32, %c0_i32_0 : i32, i32
  }
  func.func @transform_4(%arg0: i32) -> (i32, i32) {
    %c0_i32 = arith.constant 0 : i32
    %c0_i32_0 = arith.constant 0 : i32
    %c0_i32_1 = arith.constant 0 : i32
    return %c0_i32, %c0_i32_0 : i32, i32
  }
  func.func @transform_5(%arg0: i32) -> (i32, i32) {
    %c0_i32 = arith.constant 0 : i32
    %c0_i32_0 = arith.constant 0 : i32
    %c0_i32_1 = arith.constant 0 : i32
    return %c0_i32, %c0_i32_0 : i32, i32
  }
  func.func @transform_6(%arg0: i32) -> (i32, i32) {
    %c0_i32 = arith.constant 0 : i32
    %c0_i32_0 = arith.constant 0 : i32
    %c0_i32_1 = arith.constant 0 : i32
    return %c0_i32, %c0_i32_0 : i32, i32
  }
  func.func @transform_7(%arg0: i32) -> (i32, i32) {
    %c0_i32 = arith.constant 0 : i32
    %c0_i32_0 = arith.constant 0 : i32
    return %arg0, %c0_i32 : i32, i32
  }
  func.func @transform_8(%arg0: i32) -> (i32, i32) {
    %c0_i32 = arith.constant 0 : i32
    %c0_i32_0 = arith.constant 0 : i32
    return %arg0, %c0_i32 : i32, i32
  }
  func.func @transform_9(%arg0: i32) -> (i32, i32) {
    %c0_i32 = arith.constant 0 : i32
    %c0_i32_0 = arith.constant 0 : i32
    return %arg0, %c0_i32 : i32, i32
  }
}

module attributes {stable_mosaic.version = 11 : i64} {
  func.func @_gelu_glu_res_kernel(%arg0: i32, %arg1: memref<16x32xf32, #tpu.memory_space<vmem>>, %arg2: memref<32x32xbf16, #tpu.memory_space<vmem>>, %arg3: memref<1x32xf32, #tpu.memory_space<vmem>>, %arg4: memref<32x32xbf16, #tpu.memory_space<vmem>>, %arg5: memref<1x32xf32, #tpu.memory_space<vmem>>, %arg6: memref<16x32xf32, #tpu.memory_space<vmem>>, %arg7: memref<16x32xf32, #tpu.memory_space<vmem>>) attributes {dimension_semantics = [#tpu.dimension_semantics<parallel>], iteration_bounds = array<i64: 1>, scalar_prefetch = 0 : i64, scratch_operands = 0 : i64, tpu.core_type = #tpu.core_type<tc>, window_params = [{transform_indices = @transform_0, window_bounds = array<i64: 16, 32>}, {pipeline_mode = #tpu.pipeline_mode<synchronous>, transform_indices = @transform_1, window_bounds = array<i64: 32, 32>}, {pipeline_mode = #tpu.pipeline_mode<synchronous>, transform_indices = @transform_2, window_bounds = array<i64: 1, 32>}, {pipeline_mode = #tpu.pipeline_mode<synchronous>, transform_indices = @transform_3, window_bounds = array<i64: 32, 32>}, {pipeline_mode = #tpu.pipeline_mode<synchronous>, transform_indices = @transform_4, window_bounds = array<i64: 1, 32>}, {transform_indices = @transform_5, window_bounds = array<i64: 16, 32>}, {transform_indices = @transform_6, window_bounds = array<i64: 16, 32>}]} {
    %c0 = arith.constant 0 : index
    %c0_0 = arith.constant 0 : index
    %0 = vector.load %arg1[%c0, %c0_0] : memref<16x32xf32, #tpu.memory_space<vmem>>, vector<16x32xf32>
    %cst = arith.constant 5.000000e-01 : f32
    %1 = vector.broadcast %cst : f32 to vector<16x32xf32>
    %2 = arith.mulf %1, %0 : vector<16x32xf32>
    %cst_1 = arith.constant 4.471500e-02 : f32
    %3 = vector.broadcast %cst_1 : f32 to vector<16x32xf32>
    %4 = arith.mulf %3, %0 : vector<16x32xf32>
    %5 = arith.mulf %4, %0 : vector<16x32xf32>
    %6 = arith.mulf %5, %0 : vector<16x32xf32>
    %7 = arith.addf %0, %6 : vector<16x32xf32>
    %cst_2 = arith.constant 0.797884583 : f32
    %8 = vector.broadcast %cst_2 : f32 to vector<16x32xf32>
    %9 = arith.mulf %8, %7 : vector<16x32xf32>
    %10 = math.tanh %9 : vector<16x32xf32>
    %cst_3 = arith.constant 1.000000e+00 : f32
    %11 = vector.broadcast %cst_3 : f32 to vector<16x32xf32>
    %12 = arith.addf %11, %10 : vector<16x32xf32>
    %13 = arith.mulf %2, %12 : vector<16x32xf32>
    %14 = arith.truncf %13 : vector<16x32xf32> to vector<16x32xbf16>
    %c0_4 = arith.constant 0 : index
    %c0_5 = arith.constant 0 : index
    %15 = vector.load %arg2[%c0_4, %c0_5] : memref<32x32xbf16, #tpu.memory_space<vmem>>, vector<32x32xbf16>
    %cst_6 = arith.constant dense<0.000000e+00> : vector<16x32xf32>
    %16 = tpu.matmul %14, %15, %cst_6 {dimension_numbers = #tpu.dot_dimension_numbers<[1], [0], [0], [1], [0, 0, 1, 1], [], []>} : vector<16x32xbf16>, vector<32x32xbf16>, vector<16x32xf32> -> vector<16x32xf32>
    %c0_7 = arith.constant 0 : index
    %c0_8 = arith.constant 0 : index
    %17 = vector.load %arg3[%c0_7, %c0_8] : memref<1x32xf32, #tpu.memory_space<vmem>>, vector<1x32xf32>
    %18 = vector.broadcast %17 : vector<1x32xf32> to vector<16x32xf32>
    %19 = arith.addf %16, %18 : vector<16x32xf32>
    %c0_9 = arith.constant 0 : index
    %c0_10 = arith.constant 0 : index
    %20 = vector.load %arg4[%c0_9, %c0_10] : memref<32x32xbf16, #tpu.memory_space<vmem>>, vector<32x32xbf16>
    %cst_11 = arith.constant dense<0.000000e+00> : vector<16x32xf32>
    %21 = tpu.matmul %14, %20, %cst_11 {dimension_numbers = #tpu.dot_dimension_numbers<[1], [0], [0], [1], [0, 0, 1, 1], [], []>} : vector<16x32xbf16>, vector<32x32xbf16>, vector<16x32xf32> -> vector<16x32xf32>
    %c0_12 = arith.constant 0 : index
    %c0_13 = arith.constant 0 : index
    %22 = vector.load %arg5[%c0_12, %c0_13] : memref<1x32xf32, #tpu.memory_space<vmem>>, vector<1x32xf32>
    %23 = vector.broadcast %22 : vector<1x32xf32> to vector<16x32xf32>
    %24 = arith.addf %21, %23 : vector<16x32xf32>
    %cst_14 = arith.constant 0.000000e+00 : f32
    %25 = vector.broadcast %cst_14 : f32 to vector<16x32xf32>
    %26 = arith.subf %25, %24 : vector<16x32xf32>
    %27 = math.exp %26 : vector<16x32xf32>
    %cst_15 = arith.constant 1.000000e+00 : f32
    %28 = vector.broadcast %cst_15 : f32 to vector<16x32xf32>
    %29 = arith.addf %28, %27 : vector<16x32xf32>
    %cst_16 = arith.constant 1.000000e+00 : f32
    %30 = vector.broadcast %cst_16 : f32 to vector<16x32xf32>
    %31 = arith.divf %30, %29 : vector<16x32xf32>
    %32 = arith.mulf %19, %31 : vector<16x32xf32>
    %c0_17 = arith.constant 0 : index
    %c0_18 = arith.constant 0 : index
    %33 = vector.load %arg6[%c0_17, %c0_18] : memref<16x32xf32, #tpu.memory_space<vmem>>, vector<16x32xf32>
    %34 = arith.addf %32, %33 : vector<16x32xf32>
    %c0_19 = arith.constant 0 : index
    %c0_20 = arith.constant 0 : index
    %35 = vector.load %arg7[%c0_19, %c0_20] : memref<16x32xf32, #tpu.memory_space<vmem>>, vector<16x32xf32>
    tpu.vector_store %arg7[%c0_19, %c0_20], %34 {strides = array<i32>} : memref<16x32xf32, #tpu.memory_space<vmem>>, vector<16x32xf32>,
    return
  }
  func.func @transform_0(%arg0: i32) -> (i32, i32) {
    %c0_i32 = arith.constant 0 : i32
    %c0_i32_0 = arith.constant 0 : i32
    return %arg0, %c0_i32 : i32, i32
  }
  func.func @transform_1(%arg0: i32) -> (i32, i32) {
    %c0_i32 = arith.constant 0 : i32
    %c0_i32_0 = arith.constant 0 : i32
    %c0_i32_1 = arith.constant 0 : i32
    return %c0_i32, %c0_i32_0 : i32, i32
  }
  func.func @transform_2(%arg0: i32) -> (i32, i32) {
    %c0_i32 = arith.constant 0 : i32
    %c0_i32_0 = arith.constant 0 : i32
    %c0_i32_1 = arith.constant 0 : i32
    return %c0_i32, %c0_i32_0 : i32, i32
  }
  func.func @transform_3(%arg0: i32) -> (i32, i32) {
    %c0_i32 = arith.constant 0 : i32
    %c0_i32_0 = arith.constant 0 : i32
    %c0_i32_1 = arith.constant 0 : i32
    return %c0_i32, %c0_i32_0 : i32, i32
  }
  func.func @transform_4(%arg0: i32) -> (i32, i32) {
    %c0_i32 = arith.constant 0 : i32
    %c0_i32_0 = arith.constant 0 : i32
    %c0_i32_1 = arith.constant 0 : i32
    return %c0_i32, %c0_i32_0 : i32, i32
  }
  func.func @transform_5(%arg0: i32) -> (i32, i32) {
    %c0_i32 = arith.constant 0 : i32
    %c0_i32_0 = arith.constant 0 : i32
    return %arg0, %c0_i32 : i32, i32
  }
  func.func @transform_6(%arg0: i32) -> (i32, i32) {
    %c0_i32 = arith.constant 0 : i32
    %c0_i32_0 = arith.constant 0 : i32
    return %arg0, %c0_i32 : i32, i32
  }
}

module attributes {stable_mosaic.version = 11 : i64} {
  func.func @_decoder_cls_kernel(%arg0: i32, %arg1: memref<2x8x32xf32, #tpu.memory_space<vmem>>, %arg2: memref<32x4xbf16, #tpu.memory_space<vmem>>, %arg3: memref<1x4xf32, #tpu.memory_space<vmem>>, %arg4: memref<2x4xf32, #tpu.memory_space<vmem>>) attributes {dimension_semantics = [#tpu.dimension_semantics<parallel>], iteration_bounds = array<i64: 1>, scalar_prefetch = 0 : i64, scratch_operands = 0 : i64, tpu.core_type = #tpu.core_type<tc>, window_params = [{transform_indices = @transform_0, window_bounds = array<i64: 2, 8, 32>}, {pipeline_mode = #tpu.pipeline_mode<synchronous>, transform_indices = @transform_1, window_bounds = array<i64: 32, 4>}, {pipeline_mode = #tpu.pipeline_mode<synchronous>, transform_indices = @transform_2, window_bounds = array<i64: 1, 4>}, {transform_indices = @transform_3, window_bounds = array<i64: 2, 4>}]} {
    %c0 = arith.constant 0 : index
    %c0_0 = arith.constant 0 : index
    %c0_1 = arith.constant 0 : index
    %0 = vector.load %arg1[%c0, %c0_0, %c0_1] : memref<2x8x32xf32, #tpu.memory_space<vmem>>, vector<2x8x32xf32>
    %cst = arith.constant dense<0.000000e+00> : vector<2x32xf32>
    %1 = vector.multi_reduction <add>, %0, %cst [1] : vector<2x8x32xf32> to vector<2x32xf32>
    %cst_2 = arith.constant 8.000000e+00 : f32
    %2 = vector.broadcast %cst_2 : f32 to vector<2x32xf32>
    %3 = arith.divf %1, %2 : vector<2x32xf32>
    %4 = arith.truncf %3 : vector<2x32xf32> to vector<2x32xbf16>
    %c0_3 = arith.constant 0 : index
    %c0_4 = arith.constant 0 : index
    %5 = vector.load %arg2[%c0_3, %c0_4] : memref<32x4xbf16, #tpu.memory_space<vmem>>, vector<32x4xbf16>
    %cst_5 = arith.constant dense<0.000000e+00> : vector<2x4xf32>
    %6 = tpu.matmul %4, %5, %cst_5 {dimension_numbers = #tpu.dot_dimension_numbers<[1], [0], [0], [1], [0, 0, 1, 1], [], []>} : vector<2x32xbf16>, vector<32x4xbf16>, vector<2x4xf32> -> vector<2x4xf32>
    %c0_6 = arith.constant 0 : index
    %c0_7 = arith.constant 0 : index
    %7 = vector.load %arg3[%c0_6, %c0_7] : memref<1x4xf32, #tpu.memory_space<vmem>>, vector<1x4xf32>
    %8 = vector.broadcast %7 : vector<1x4xf32> to vector<2x4xf32>
    %9 = arith.addf %6, %8 : vector<2x4xf32>
    %cst_8 = arith.constant dense<0xFF800000> : vector<2xf32>
    %10 = vector.multi_reduction <maximumf>, %9, %cst_8 [1] : vector<2x4xf32> to vector<2xf32>
    %11 = vector.shape_cast %10 : vector<2xf32> to vector<2x1xf32>
    %12 = vector.broadcast %11 : vector<2x1xf32> to vector<2x4xf32>
    %13 = arith.subf %9, %12 : vector<2x4xf32>
    %14 = math.exp %13 : vector<2x4xf32>
    %cst_9 = arith.constant dense<0.000000e+00> : vector<2xf32>
    %15 = vector.multi_reduction <add>, %14, %cst_9 [1] : vector<2x4xf32> to vector<2xf32>
    %16 = vector.shape_cast %15 : vector<2xf32> to vector<2x1xf32>
    %17 = vector.broadcast %16 : vector<2x1xf32> to vector<2x4xf32>
    %18 = arith.divf %14, %17 : vector<2x4xf32>
    %c0_10 = arith.constant 0 : index
    %c0_11 = arith.constant 0 : index
    %19 = vector.load %arg4[%c0_10, %c0_11] : memref<2x4xf32, #tpu.memory_space<vmem>>, vector<2x4xf32>
    tpu.vector_store %arg4[%c0_10, %c0_11], %18 {strides = array<i32>} : memref<2x4xf32, #tpu.memory_space<vmem>>, vector<2x4xf32>,
    return
  }
  func.func @transform_0(%arg0: i32) -> (i32, i32, i32) {
    %c0_i32 = arith.constant 0 : i32
    %c0_i32_0 = arith.constant 0 : i32
    %c0_i32_1 = arith.constant 0 : i32
    return %arg0, %c0_i32, %c0_i32_0 : i32, i32, i32
  }
  func.func @transform_1(%arg0: i32) -> (i32, i32) {
    %c0_i32 = arith.constant 0 : i32
    %c0_i32_0 = arith.constant 0 : i32
    %c0_i32_1 = arith.constant 0 : i32
    return %c0_i32, %c0_i32_0 : i32, i32
  }
  func.func @transform_2(%arg0: i32) -> (i32, i32) {
    %c0_i32 = arith.constant 0 : i32
    %c0_i32_0 = arith.constant 0 : i32
    %c0_i32_1 = arith.constant 0 : i32
    return %c0_i32, %c0_i32_0 : i32, i32
  }
  func.func @transform_3(%arg0: i32) -> (i32, i32) {
    %c0_i32 = arith.constant 0 : i32
    %c0_i32_0 = arith.constant 0 : i32
    return %arg0, %c0_i32 : i32, i32
  }
}

</mosaic_0001>

<bundles_post_ra>
// kernel: mamba_forward.8
= control target key start
LH: loop header
LB: loop body
LE: loop exit
PB: predicated region body
PF: predicated region fallthrough
CT: control target
= control target key end

     0   :  { %vm27_vm0 = vcmask 1041408   ;;  %vm23_vm1 = vcmask 31744   ;;  %vm45_vm2 = vcmask 261120   ;;  %s92_s1 = inlined_call_operand.vmem [shape: bf16[4,32], index: 1, kind: input, shape index: {}]   ;;  %s93_s0 = inlined_call_operand.vmem [shape: f32[16,4], index: 0, kind: input, shape index: {}]   ;;  %s94_s2 = inlined_call_operand.vmem [shape: f32[1,32], index: 2, kind: input, shape index: {}]   ;;  %s95_s3 = inlined_call_operand.vmem [shape: f32[16,32], index: 3, kind: output, shape index: {}]  }
   0x1   :  { %v18_v0 = vld [vmem:[%s92_s1] sm:$0x3]  ;;  %v16_v2 = vld [vmem:[%s93_s0 + $0x8] sm:$0xff] }
   0x2   :  { %v15_v1 = vld [vmem:[%s93_s0] sm:$0xff]  ;;  %v29_v3 = vsel %vm27_vm0, %v18_v0, 0 }
   0x3   :  { %v17_v4 = vpack.c.bf16 %v16_v2, %v15_v1  ;;  %38 = vmatpush.bf16.msra.mxu0 %v29_v3  ;;  %v53_v5 = vld [vmem:[%s94_s2] ss:$0 sm:$0xff] }
   0x6   :  { %52 = vmatmul.msk.bf16.vlgmr.msra.gmra.mxu0 %vm23_vm1, %v17_v4 }
  0x83   :  { %v40_v6 = vpop.f32.mrf.mxu0 }
  0x84   :  { %v41_v7 = vadd.f32 %v53_v5, %v40_v6 }
  0x86   :  { %46 = vst.msk [vmem:[%s95_s3] sm:$0xff] %vm45_vm2, %v41_v7 }
  0x8b   :  { %v42_v8 = vpop.f32.mrf.mxu0 }
  0x8c   :  { %v43_v9 = vadd.f32 %v53_v5, %v42_v8 }
  0x8e   :  { %47 = vst.msk [vmem:[%s95_s3 + $0x8] sm:$0xff] %vm45_vm2, %v43_v9 }

// kernel: mamba_forward.9
= control target key start
LH: loop header
LB: loop body
LE: loop exit
PB: predicated region body
PF: predicated region fallthrough
CT: control target
= control target key end

     0   :  { %vm32_vm0 = vcmask 261120   ;;  %v258_v4 = vmov 32.0   ;;  %vm202_vm8 = vcmask 130048   ;;  %s367_s0 = inlined_call_operand.vmem [shape: f32[16,32], index: 0, kind: input, shape index: {}]   ;;  %s368_s1 = inlined_call_operand.vmem [shape: f32[1,32], index: 1, kind: input, shape index: {}]   ;;  %s369_s2 = inlined_call_operand.vmem [shape: f32[1,32], index: 2, kind: input, shape index: {}]   ;;  %s370_s4 = inlined_call_operand.vmem [shape: f32[1,32], index: 4, kind: input, shape index: {}]   ;;  %s371_s3 = inlined_call_operand.vmem [shape: bf16[32,32], index: 3, kind: input, shape index: {}]   ;;  %s372_s5 = inlined_call_operand.vmem [shape: bf16[32,16], index: 5, kind: input, shape index: {}]   ;;  %s373_s7 = inlined_call_operand.vmem [shape: f32[16,32], index: 7, kind: output, shape index: {0}]   ;;  %s374_s6 = inlined_call_operand.vmem [shape: f32[1,16], index: 6, kind: input, shape index: {}]   ;;  %s375_s9 = inlined_call_operand.vmem [shape: f32[16,16], index: 9, kind: output, shape index: {2}]   ;;  %s376_s8 = inlined_call_operand.vmem [shape: f32[16,32], index: 8, kind: output, shape index: {1}]  }
   0x1   :  { %v30_v0 = vld [vmem:[%s367_s0] sm:$0xff]  ;;  %v31_v2 = vld [vmem:[%s367_s0 + $0x8] sm:$0xff]  ;;  %244 = vrcp.f32 %v258_v4 }
   0x2   :  { %v33_v1 = vsel %vm32_vm0, %v30_v0, 0.0  ;;  %v36_v3 = vsel %vm32_vm0, %v31_v2, 0.0  ;;  %v236_v21 = vld [vmem:[%s371_s3 + $0x8] sm:$0xff]  ;;  %v235_v24 = vld [vmem:[%s371_s3] sm:$0xff] }
   0x3   :  { %34 = vadd.xlane.f32.xlu0 %v33_v1  ;;  %v238_v22 = vld [vmem:[%s372_s5 + $0x8] sm:$0xff]  ;;  %128 = vmatpush.bf16.msra.mxu0 %v236_v21  ;;  %v237_v25 = vld [vmem:[%s372_s5] sm:$0xff] }
   0x4   :  { %194 = vmatpush.bf16.msra.mxu1 %v238_v22  ;;  %v240_v39 = vld [vmem:[%s368_s1] ss:$0 sm:$0xff] }
   0x5   :  { %v241_v43 = vld [vmem:[%s369_s2] ss:$0 sm:$0xff] }
   0x6   :  { %v242_v54 = vld [vmem:[%s370_s4] ss:$0 sm:$0xff] }
   0x7   :  { %v245_v5 = vpop.eup %244  ;;  %129 = vmatpush.bf16.msra.mxu0 %v235_v24  ;;  %v243_v55 = vld [vmem:[%s374_s6] ss:$0 sm:$0xff] }
   0x8   :  { %v40_v6 = vmul.f32 32.0, %v245_v5  ;;  %vm44_vm1 = vweird.f32 %v245_v5  ;;  %195 = vmatpush.bf16.msra.mxu1 %v237_v25 }
   0xa   :  { %v41_v7 = vsub.f32 1.0, %v40_v6 }
   0xb   :  { %37 = vadd.xlane.f32.xlu0 %v36_v3 }
   0xc   :  { %v42_v8 = vmul.f32 %v245_v5, %v41_v7 }
   0xe   :  { %v43_v9 = vadd.f32 %v245_v5, %v42_v8 }
  0x10   :  { %v45_v10 = vsel %vm44_vm1, %v245_v5, %v43_v9 }
  0x76   :  { %v35_v11 = vpop.xlane.xlu0 %34 }
  0x77   :  { %v46_v12 = vmul.f32 %v45_v10, %v35_v11 }
  0x79   :  { %v48_v13 = vsub.f32 %v30_v0, %v46_v12 }
  0x7b   :  { %v50_v14 = vmul.f32 %v48_v13, %v48_v13 }
  0x7d   :  { %v52_v15 = vsel %vm32_vm0, %v50_v14, 0.0 }
  0x7e   :  { %53 = vadd.xlane.f32.xlu1 %v52_v15  ;;  %v38_v16 = vpop.xlane.xlu0 %37 }
  0x7f   :  { %v47_v17 = vmul.f32 %v45_v10, %v38_v16 }
  0x81   :  { %v49_v18 = vsub.f32 %v31_v2, %v47_v17 }
  0x83   :  { %v51_v19 = vmul.f32 %v49_v18, %v49_v18 }
  0x85   :  { %v55_v20 = vsel %vm32_vm0, %v51_v19, 0.0 }
  0x86   :  { %56 = vadd.xlane.f32.xlu1 %v55_v20 }
  0xf1   :  { %v54_v23 = vpop.xlane.xlu1 %53 }
  0xf2   :  { %v58_v26 = vmul.f32 %v54_v23, %v45_v10 }
  0xf4   :  { %v60_v27 = vadd.f32 1e-05, %v58_v26 }
  0xf6   :  { %246 = vrsqrt.f32 %v60_v27  ;;  %vm68_vm3 = vweird.f32 %v60_v27 }
  0xf9   :  { %v57_v28 = vpop.xlane.xlu1 %56 }
  0xfa   :  { %v59_v29 = vmul.f32 %v57_v28, %v45_v10 }
  0xfc   :  { %v247_v30 = vpop.eup %246  ;;  %v61_v31 = vadd.f32 1e-05, %v59_v29 }
  0xfd   :  { %v63_v32 = vmul.f32 %v247_v30, %v60_v27  ;;  %vm69_vm2 = vweird.f32 %v247_v30 }
  0xfe   :  { %248 = vrsqrt.f32 %v61_v31  ;;  %vm70_vm4 = vmor %vm68_vm3, %vm69_vm2  ;;  %vm78_vm6 = vweird.f32 %v61_v31 }
  0xff   :  { %v64_v33 = vmul.f32 %v247_v30, %v63_v32 }
 0x101   :  { %v65_v34 = vmul.f32 0.5, %v64_v33 }
 0x103   :  { %v66_v35 = vsub.f32 1.5, %v65_v34 }
 0x104   :  { %v249_v36 = vpop.eup %248 }
 0x105   :  { %v67_v37 = vmul.f32 %v247_v30, %v66_v35  ;;  %v73_v38 = vmul.f32 %v249_v36, %v61_v31  ;;  %vm79_vm5 = vweird.f32 %v249_v36 }
 0x106   :  { %vm80_vm7 = vmor %vm78_vm6, %vm79_vm5 }
 0x107   :  { %v71_v40 = vsel %vm70_vm4, %v247_v30, %v67_v37  ;;  %v74_v41 = vmul.f32 %v249_v36, %v73_v38 }
 0x108   :  { %v82_v42 = vmul.f32 %v71_v40, %v48_v13 }
 0x109   :  { %v75_v44 = vmul.f32 0.5, %v74_v41 }
 0x10a   :  { %v88_v45 = vmul.f32 %v240_v39, %v82_v42 }
 0x10b   :  { %v76_v46 = vsub.f32 1.5, %v75_v44 }
 0x10c   :  { %v94_v47 = vadd.f32 %v241_v43, %v88_v45 }
 0x10d   :  { %v77_v48 = vmul.f32 %v249_v36, %v76_v46 }
 0x10e   :  { %96 = vst.msk [vmem:[%s373_s7] sm:$0xff] %vm32_vm0, %v94_v47 }
 0x10f   :  { %v81_v49 = vsel %vm80_vm7, %v249_v36, %v77_v48 }
 0x110   :  { %v83_v50 = vmul.f32 %v81_v49, %v49_v18 }
 0x112   :  { %v89_v51 = vmul.f32 %v240_v39, %v83_v50 }
 0x114   :  { %v95_v52 = vadd.f32 %v241_v43, %v89_v51 }
 0x116   :  { %97 = vst.msk [vmem:[%s373_s7 + $0x8] sm:$0xff] %vm32_vm0, %v95_v52  ;;  %v98_v53 = vpack.c.bf16 %v95_v52, %v94_v47 }
 0x118   :  { %225 = vmatmul.msk.bf16.vlgmr.msra.gmra.mxu0 %vm32_vm0, %v98_v53  ;;  %234 = vmatmul.msk.bf16.vlgmr.msra.gmra.mxu1 %vm32_vm0, %v98_v53 }
 0x195   :  { %v131_v56 = vpop.f32.mrf.mxu0  ;;  %v197_v57 = vpop.f32.mrf.mxu1 }
 0x196   :  { %v132_v58 = vadd.f32 %v242_v54, %v131_v56  ;;  %v198_v59 = vadd.f32 %v243_v55, %v197_v57 }
 0x198   :  { %v138_v60 = vand.u32 2147483647, %v132_v58  ;;  %203 = vst.msk [vmem:[%s375_s9] sm:$0xff] %vm202_vm8, %v198_v59  ;;  %v136_v17 = vmax.f32 %v132_v58, 0.0 }
 0x19a   :  { %v140_v61 = vsub.f32 0.0, %v138_v60 }
 0x19c   :  { %v142_v62 = vmul.f32 1.442695, %v140_v61 }
 0x19d   :  { %v133_v63 = vpop.f32.mrf.mxu0  ;;  %v199_v0 = vpop.f32.mrf.mxu1 }
 0x19e   :  { %250 = vpow2.f32 %v142_v62  ;;  %v134_v1 = vadd.f32 %v242_v54, %v133_v63  ;;  %v200_v2 = vadd.f32 %v243_v55, %v199_v0 }
 0x1a0   :  { %v139_v3 = vand.u32 2147483647, %v134_v1  ;;  %204 = vst.msk [vmem:[%s375_s9 + $0x8] sm:$0xff] %vm202_vm8, %v200_v2  ;;  %v137_v25 = vmax.f32 %v134_v1, 0.0 }
 0x1a2   :  { %v141_v4 = vsub.f32 0.0, %v139_v3 }
 0x1a4   :  { %v251_v5 = vpop.eup %250  ;;  %v144_v6 = vmul.f32 1.442695, %v141_v4 }
 0x1a5   :  { %v146_v7 = vadd.f32 1.0, %v251_v5  ;;  %v149_v8 = vmul.f32 -0.5, %v251_v5  ;;  %v152_v10 = vand.u32 2147483647, %v251_v5 }
 0x1a6   :  { %252 = vpow2.f32 %v144_v6 }
 0x1a7   :  { %254 = vlog2.f32 %v146_v7  ;;  %v150_v9 = vadd.f32 1.0, %v149_v8  ;;  %vm153_vm9 = vcmp.lt.f32.partialorder %v152_v10, 0.0004427343 }
 0x1a9   :  { %v151_v15 = vmul.f32 %v251_v5, %v150_v9 }
 0x1ac   :  { %v253_v11 = vpop.eup %252 }
 0x1ad   :  { %v255_v12 = vpop.eup %254  ;;  %v155_v13 = vadd.f32 1.0, %v253_v11  ;;  %v158_v16 = vmul.f32 -0.5, %v253_v11  ;;  %v161_v21 = vand.u32 2147483647, %v253_v11 }
 0x1ae   :  { %v148_v14 = vmul.f32 0.6931472, %v255_v12 }
 0x1af   :  { %256 = vlog2.f32 %v155_v13  ;;  %v159_v20 = vadd.f32 1.0, %v158_v16  ;;  %vm162_vm10 = vcmp.lt.f32.partialorder %v161_v21, 0.0004427343 }
 0x1b0   :  { %v154_v18 = vsel %vm153_vm9, %v151_v15, %v148_v14 }
 0x1b1   :  { %v164_v19 = vadd.f32 %v154_v18, %v136_v17  ;;  %v160_v24 = vmul.f32 %v253_v11, %v159_v20 }
 0x1b3   :  { %166 = vst.msk [vmem:[%s376_s8] sm:$0xff] %vm32_vm0, %v164_v19 }
 0x1b5   :  { %v257_v22 = vpop.eup %256 }
 0x1b6   :  { %v157_v23 = vmul.f32 0.6931472, %v257_v22 }
 0x1b8   :  { %v163_v26 = vsel %vm162_vm10, %v160_v24, %v157_v23 }
 0x1b9   :  { %v165_v27 = vadd.f32 %v163_v26, %v137_v25 }
 0x1bb   :  { %167 = vst.msk [vmem:[%s376_s8 + $0x8] sm:$0xff] %vm32_vm0, %v165_v27 }

// kernel: mamba_forward.10
= control target key start
LH: loop header
LB: loop body
LE: loop exit
PB: predicated region body
PF: predicated region fallthrough
CT: control target
= control target key end

     0   :  { %s856_s21 = smov 0   ;;  %s858_s22 = smov 0   ;;  %s936_s0 = inlined_call_operand.vmem [shape: f32[2,8,32], index: 0, kind: input, shape index: {}]   ;;  %s937_s1 = inlined_call_operand.vmem [shape: f32[2,8,32], index: 1, kind: input, shape index: {}]   ;;  %s938_s2 = inlined_call_operand.vmem [shape: f32[2,1,8,8], index: 2, kind: input, shape index: {}]   ;;  %s939_s3 = inlined_call_operand.vmem [shape: f32[2,1,8,8], index: 3, kind: input, shape index: {}]   ;;  %s940_s4 = inlined_call_operand.vmem [shape: f32[8,32], index: 4, kind: input, shape index: {}]   ;;  %s941_s5 = inlined_call_operand.vmem [shape: f32[1,32], index: 5, kind: input, shape index: {}]   ;;  %s942_s6 = inlined_call_operand.vmem [shape: f32[2,8,32], index: 6, kind: output, shape index: {}]  }
   0x1   :  { %s860_s23 = smov 0  }
   0x2 LB: > { %s28_s24 = sadd.s32 1, %s806_s22  ;;  %p715_p0 = scmp.ge.s32.totalorder %s810_s23, 1  ;;  %s810_s23 = sphi %s860_s23, %s16_s23   ;;  %s806_s22 = sphi %s858_s22, %s944_s22   ;;  %s802_s21 = sphi %s856_s21, %s943_s21  }
   0x3   : > { %p30_p1 = scmp.ge.s32.totalorder %s28_s24, 2  ;;  %p272_p2 = scmp.lt.s32.totalorder %s810_s23, 3 }
   0x5   : > { %s946_s24 = smov (%p30_p1, %s28_s24), 0  ;;  %p273_p3 = pnand %p715_p0, %p272_p2 }
   0x6   : > { %p327_p4 = scmp.lt.s32.totalorder (!%p273_p3), %s802_s21, 1 }
   0x7   : > { %276 = sbr.rel (%p273_p3) target bundleno = 196 (0xc4), region = 44 }
   0xc   : > { %v812_v0 = vmov 1   ;;  %v813_v1 = vmov 0   ;;  %s948_s21 = smov (!%p327_p4, %s802_s21), 1  ;;  %v814_v2 = vmov 3   ;;  %v815_v5 = vmov 2   ;;  %v368_v13 = vld [vmem:[%s940_s4] sm:$0xff] }
   0xd   : > { %757 = vset.pattern.permute.xlu1 %v812_v0  ;;  %756 = vset.pattern.permute.xlu0 %v813_v1  ;;  %s874_s25 = sshll.u32 %s948_s21, 3  ;;  %v816_v6 = vmov 4   ;;  %v817_v7 = vmov 5   ;;  %v818_v8 = vmov 6   ;;  %v819_v9 = vmov 7  }
   0xe   : > { %759 = vset.pattern.permute.xlu2 %v814_v2  ;;  %s347_s28 = scalar_lea.vmem %s938_s2, %s874_s25  ;;  %s354_s7 = scalar_lea.vmem %s939_s3, %s874_s25  ;;  %vm366_vm0 = vcmask 261120   ;;  %v820_v10 = vmov 0.0   ;;  %vm571_vm1 = vcmask 1040384   ;;  %vm573_vm2 = vcmask 1041408  }
   0xf   : > { %v378_v3 = vld [vmem:[%s347_s28] sm:$0xff]  ;;  %367 = vst.msk [vmem:[#allocation2] sm:$0xff] %vm366_vm0, %v820_v10  ;;  %s333_s10 = scalar_lea.vmem %s936_s0, %s874_s25  ;;  %s340_s15 = scalar_lea.vmem %s937_s1, %s874_s25  ;;  %vm575_vm3 = vcmask 1042432   ;;  %vm577_vm4 = vcmask 1043456   ;;  %vm579_vm5 = vcmask 1044480   ;;  %vm581_vm6 = vcmask 1045504  }
  0x10   : > { %409 = vperm.xlu1 %757, %v378_v3   ;;  %383 = vperm.xlu0 %756, %v378_v3   ;;  %v379_v4 = vld [vmem:[%s354_s7] sm:$0xff]  ;;  %vm583_vm7 = vcmask 1046528   ;;  %s361_s20 = scalar_lea.vmem %s942_s6, %s874_s25 }
  0x11   : > { %457 = vperm.xlu2 %759, %v378_v3   ;;  %v371_v11 = vld [vmem:[%s333_s10] sm:$0xff] }
  0x12   : > { %v374_v12 = vperm.slane %v371_v11, 0  ;;  %v403_v16 = vperm.slane %v371_v11, 1  ;;  %v427_v19 = vperm.slane %v371_v11, 2  ;;  %v896_v20 = vld [vmem:[%s340_s15] sm:$0xff]  ;;  %v451_v24 = vperm.slane %v371_v11, 3 }
  0x13   : > { %v899_v25 = vmul.f32 %v896_v20, %v371_v11  ;;  %v475_v30 = vperm.slane %v371_v11, 4  ;;  %v499_v40 = vperm.slane %v371_v11, 5  ;;  %v523_v47 = vperm.slane %v371_v11, 6 }
  0x14   : > { %v375_v15 = vmul.f32 %v374_v12, %v368_v13  ;;  %v404_v18 = vmul.f32 %v403_v16, %v368_v13  ;;  %v428_v23 = vmul.f32 %v427_v19, %v368_v13  ;;  %v452_v29 = vmul.f32 %v451_v24, %v368_v13 }
  0x15   : > { %v386_v31 = vperm.slane %v899_v25, 0  ;;  %v476_v36 = vmul.f32 %v475_v30, %v368_v13  ;;  %v412_v37 = vperm.slane %v899_v25, 1  ;;  %v500_v46 = vmul.f32 %v499_v40, %v368_v13 }
  0x16   : > { %v376_v17 = vmul.f32 1.442695, %v375_v15  ;;  %v405_v22 = vmul.f32 1.442695, %v404_v18  ;;  %v370_v27 = vld [vmem:[#allocation2] sm:$0xff]  ;;  %v436_v49 = vperm.slane %v899_v25, 2  ;;  %v524_v55 = vmul.f32 %v523_v47, %v368_v13 }
  0x17   : > { %v429_v28 = vmul.f32 1.442695, %v428_v23  ;;  %v453_v35 = vmul.f32 1.442695, %v452_v29  ;;  %v477_v43 = vmul.f32 1.442695, %v476_v36 }
  0x18   : > { %758 = vset.pattern.permute.xlu1 %v815_v5  ;;  %391 = vperm.xlu0 %756, %v379_v4   ;;  %772 = vpow2.f32 %v376_v17  ;;  %v501_v54 = vmul.f32 1.442695, %v500_v46  ;;  %v547_v56 = vperm.slane %v371_v11, 7  ;;  %v460_v58 = vperm.slane %v899_v25, 3 }
  0x19   : > { %433 = vperm.xlu1 %758, %v378_v3   ;;  %760 = vset.pattern.permute.xlu2 %v816_v6  ;;  %774 = vpow2.f32 %v405_v22  ;;  %v525_v62 = vmul.f32 1.442695, %v524_v55  ;;  %v556_v24 = vperm.slane %v899_v25, 7 }
  0x1a   : > { %481 = vperm.xlu2 %760, %v378_v3   ;;  %776 = vpow2.f32 %v429_v28  ;;  %v548_v63 = vmul.f32 %v547_v56, %v368_v13 }
  0x1b   : > { %778 = vpow2.f32 %v453_v35 }
  0x1c   : > { %780 = vpow2.f32 %v477_v43 }
  0x1d   : > { %782 = vpow2.f32 %v501_v54 }
  0x1e   : > { %v773_v26 = vpop.eup %772  ;;  %784 = vpow2.f32 %v525_v62 }
  0x1f   : > { %v380_v32 = vmul.f32 %v773_v26, %v370_v27  ;;  %v775_v41 = vpop.eup %774 }
  0x20   : > { %761 = vset.pattern.permute.xlu0 %v817_v7  ;;  %v777_v48 = vpop.eup %776 }
  0x21   : > { %762 = vset.pattern.permute.xlu1 %v818_v8  ;;  %505 = vperm.xlu0 %761, %v378_v3   ;;  %v779_v57 = vpop.eup %778 }
  0x22   : > { %529 = vperm.xlu1 %762, %v378_v3   ;;  %763 = vset.pattern.permute.xlu2 %v812_v0  ;;  %v781_v0 = vpop.eup %780 }
  0x23   : > { %416 = vperm.xlu2 %763, %v379_v4   ;;  %v783_v11 = vpop.eup %782 }
  0x24   : > { %v785_v19 = vpop.eup %784 }
  0x29   : > { %766 = vset.pattern.permute.xlu0 %v819_v9 }
  0x2a   : > { %764 = vset.pattern.permute.xlu1 %v815_v5  ;;  %553 = vperm.xlu0 %766, %v378_v3   ;;  %v508_v5 = vperm.slane %v899_v25, 5 }
  0x2b   : > { %440 = vperm.xlu1 %764, %v379_v4   ;;  %765 = vset.pattern.permute.xlu2 %v814_v2  ;;  %v484_v2 = vperm.slane %v899_v25, 4 }
  0x2c   : > { %464 = vperm.xlu2 %765, %v379_v4  }
  0x33   : > { %767 = vset.pattern.permute.xlu1 %v816_v6 }
  0x34   : > { %488 = vperm.xlu1 %767, %v379_v4   ;;  %768 = vset.pattern.permute.xlu2 %v817_v7  ;;  %v549_v7 = vmul.f32 1.442695, %v548_v63 }
  0x35   : > { %512 = vperm.xlu2 %768, %v379_v4  }
  0x36   : > { %786 = vpow2.f32 %v549_v7 }
  0x3c   : > { %769 = vset.pattern.permute.xlu1 %v818_v8  ;;  %v787_v29 = vpop.eup %786 }
  0x3d   : > { %536 = vperm.xlu1 %769, %v379_v4   ;;  %770 = vset.pattern.permute.xlu2 %v819_v9 }
  0x3e   : > { %560 = vperm.xlu2 %770, %v379_v4  }
  0x6b   : > { %v458_v14 = vpop.permute.xlu2 %457 }
  0x6c   : > { %v461_v1 = vmul.f32 %v460_v58, %v458_v14  ;;  %v532_v14 = vperm.slane %v899_v25, 6 }
  0x74   : > { %v482_v21 = vpop.permute.xlu2 %481 }
  0x75   : > { %v485_v8 = vmul.f32 %v484_v2, %v482_v21 }
  0x7d   : > { %v417_v39 = vpop.permute.xlu2 %416 }
  0x82   : > { %v410_v33 = vpop.permute.xlu1 %409  ;;  %v384_v34 = vpop.permute.xlu0 %383 }
  0x83   : > { %v387_v38 = vmul.f32 %v386_v31, %v384_v34  ;;  %v413_v44 = vmul.f32 %v412_v37, %v410_v33 }
  0x85   : > { %v388_v42 = vadd.f32 %v387_v38, %v380_v32 }
  0x86   : > { %v465_v60 = vpop.permute.xlu2 %464 }
  0x87   : > { %v407_v45 = vmul.f32 %v775_v41, %v388_v42 }
  0x89   : > { %v414_v50 = vadd.f32 %v413_v44, %v407_v45 }
  0x8a   : > { %v392_v51 = vpop.permute.xlu0 %391 }
  0x8b   : > { %v434_v52 = vpop.permute.xlu1 %433  ;;  %v431_v53 = vmul.f32 %v777_v48, %v414_v50  ;;  %v419_v12 = vmul.f32 %v417_v39, %v414_v50  ;;  %v394_v17 = vmul.f32 %v392_v51, %v388_v42 }
  0x8c   : > { %v437_v59 = vmul.f32 %v436_v49, %v434_v52 }
  0x8d   : > { %v420_v22 = vsel %vm366_vm0, %v419_v12, 0.0  ;;  %v396_v21 = vsel %vm366_vm0, %v394_v17, 0.0 }
  0x8e   : > { %v438_v61 = vadd.f32 %v437_v59, %v431_v53  ;;  %v421_v30 = vrot.slane %v420_v22, 4  ;;  %v397_v33 = vrot.slane %v396_v21, 4 }
  0x8f   : > { %v513_v13 = vpop.permute.xlu2 %512 }
  0x90   : > { %v455_v3 = vmul.f32 %v779_v57, %v438_v61  ;;  %v422_v42 = vadd.f32 %v421_v30, %v420_v22  ;;  %v398_v43 = vadd.f32 %v397_v33, %v396_v21 }
  0x92   : > { %v462_v4 = vadd.f32 %v461_v1, %v455_v3  ;;  %v423_v49 = vrot.slane %v422_v42, 2  ;;  %v399_v50 = vrot.slane %v398_v43, 2 }
  0x93   : > { %v506_v6 = vpop.permute.xlu0 %505 }
  0x94   : > { %v479_v9 = vmul.f32 %v781_v0, %v462_v4  ;;  %v530_v10 = vpop.permute.xlu1 %529  ;;  %v509_v15 = vmul.f32 %v508_v5, %v506_v6  ;;  %v467_v31 = vmul.f32 %v465_v60, %v462_v4  ;;  %v424_v58 = vadd.f32 %v423_v49, %v422_v42 }
  0x95   : > { %v533_v26 = vmul.f32 %v532_v14, %v530_v10  ;;  %v400_v59 = vadd.f32 %v399_v50, %v398_v43 }
  0x96   : > { %v486_v16 = vadd.f32 %v485_v8, %v479_v9  ;;  %v468_v39 = vsel %vm366_vm0, %v467_v31, 0.0  ;;  %v425_v2 = vrot.slane %v424_v58, 1  ;;  %v771_v31 = vld [vmem:[%s941_s5] ss:$0 sm:$0xff] }
  0x97   : > { %v469_v46 = vrot.slane %v468_v39, 4  ;;  %v401_v3 = vrot.slane %v400_v59, 1 }
  0x98   : > { %v503_v18 = vmul.f32 %v783_v11, %v486_v16  ;;  %v561_v41 = vpop.permute.xlu2 %560  ;;  %v426_v12 = vadd.f32 %v425_v2, %v424_v58 }
  0x99   : > { %v470_v55 = vadd.f32 %v469_v46, %v468_v39  ;;  %v588_v39 = vmul.f32 %v771_v31, %v896_v20 }
  0x9a   : > { %v510_v23 = vadd.f32 %v509_v15, %v503_v18  ;;  %v402_v15 = vadd.f32 %v401_v3, %v400_v59 }
  0x9b   : > { %v471_v63 = vrot.slane %v470_v55, 2 }
  0x9c   : > { %v527_v27 = vmul.f32 %v785_v19, %v510_v23  ;;  %v554_v28 = vpop.permute.xlu0 %553  ;;  %v515_v40 = vmul.f32 %v513_v13, %v510_v23 }
  0x9d   : > { %v441_v32 = vpop.permute.xlu1 %440  ;;  %v557_v35 = vmul.f32 %v556_v24, %v554_v28  ;;  %v472_v8 = vadd.f32 %v471_v63, %v470_v55  ;;  %v572_v24 = vsel %vm571_vm1, %v402_v15, %v426_v12 }
  0x9e   : > { %v443_v34 = vmul.f32 %v441_v32, %v438_v61  ;;  %v534_v36 = vadd.f32 %v533_v26, %v527_v27  ;;  %v516_v48 = vsel %vm366_vm0, %v515_v40, 0.0 }
  0x9f   : > { %v517_v56 = vrot.slane %v516_v48, 4  ;;  %v473_v19 = vrot.slane %v472_v8, 1 }
  0xa0   : > { %v444_v37 = vsel %vm366_vm0, %v443_v34, 0.0  ;;  %v551_v38 = vmul.f32 %v787_v29, %v534_v36 }
  0xa1   : > { %v445_v25 = vrot.slane %v444_v37, 4  ;;  %v518_v0 = vadd.f32 %v517_v56, %v516_v48  ;;  %v474_v29 = vadd.f32 %v473_v19, %v472_v8 }
  0xa2   : > { %v558_v44 = vadd.f32 %v557_v35, %v551_v38 }
  0xa3   : > { %v446_v45 = vadd.f32 %v445_v25, %v444_v37  ;;  %v519_v9 = vrot.slane %v518_v0, 2 }
  0xa4   : > { %v563_v47 = vmul.f32 %v561_v41, %v558_v44  ;;  %591 = vst.msk [vmem:[#allocation2] sm:$0xff] %vm366_vm0, %v558_v44 }
  0xa5   : > { %v447_v52 = vrot.slane %v446_v45, 2  ;;  %v520_v22 = vadd.f32 %v519_v9, %v518_v0 }
  0xa6   : > { %v489_v51 = vpop.permute.xlu1 %488  ;;  %v564_v53 = vsel %vm366_vm0, %v563_v47, 0.0 }
  0xa7   : > { %v491_v54 = vmul.f32 %v489_v51, %v486_v16  ;;  %v565_v60 = vrot.slane %v564_v53, 4  ;;  %v448_v62 = vadd.f32 %v447_v52, %v446_v45  ;;  %v521_v30 = vrot.slane %v520_v22, 1 }
  0xa9   : > { %v492_v57 = vsel %vm366_vm0, %v491_v54, 0.0  ;;  %v566_v4 = vadd.f32 %v565_v60, %v564_v53  ;;  %v449_v6 = vrot.slane %v448_v62, 1  ;;  %v522_v37 = vadd.f32 %v521_v30, %v520_v22 }
  0xaa   : > { %v493_v61 = vrot.slane %v492_v57, 4 }
  0xab   : > { %v567_v16 = vrot.slane %v566_v4, 2  ;;  %v450_v13 = vadd.f32 %v449_v6, %v448_v62 }
  0xac   : > { %v494_v1 = vadd.f32 %v493_v61, %v492_v57 }
  0xad   : > { %v568_v21 = vadd.f32 %v567_v16, %v566_v4  ;;  %v574_v26 = vsel %vm573_vm2, %v572_v24, %v450_v13 }
  0xae   : > { %v495_v5 = vrot.slane %v494_v1, 2  ;;  %v576_v34 = vsel %vm575_vm3, %v574_v26, %v474_v29 }
  0xaf   : > { %v537_v7 = vpop.permute.xlu1 %536  ;;  %v569_v33 = vrot.slane %v568_v21, 1 }
  0xb0   : > { %v496_v10 = vadd.f32 %v495_v5, %v494_v1  ;;  %v539_v11 = vmul.f32 %v537_v7, %v534_v36 }
  0xb1   : > { %v570_v40 = vadd.f32 %v569_v33, %v568_v21 }
  0xb2   : > { %v540_v17 = vsel %vm366_vm0, %v539_v11, 0.0  ;;  %v497_v14 = vrot.slane %v496_v10, 1 }
  0xb3   : > { %v541_v18 = vrot.slane %v540_v17, 4 }
  0xb4   : > { %v498_v27 = vadd.f32 %v497_v14, %v496_v10 }
  0xb5   : > { %v542_v23 = vadd.f32 %v541_v18, %v540_v17 }
  0xb6   : > { %v578_v35 = vsel %vm577_vm4, %v576_v34, %v498_v27 }
  0xb7   : > { %v543_v28 = vrot.slane %v542_v23, 2  ;;  %v580_v25 = vsel %vm579_vm5, %v578_v35, %v522_v37 }
  0xb9   : > { %v544_v32 = vadd.f32 %v543_v28, %v542_v23 }
  0xbb   : > { %v545_v36 = vrot.slane %v544_v32, 1 }
  0xbd   : > { %v546_v38 = vadd.f32 %v545_v36, %v544_v32 }
  0xbf   : > { %v582_v41 = vsel %vm581_vm6, %v580_v25, %v546_v38 }
  0xc0   : > { %v584_v42 = vsel %vm583_vm7, %v582_v41, %v570_v40 }
  0xc1   : > { %v589_v43 = vadd.f32 %v588_v39, %v584_v42 }
  0xc3   : > { %590 = vst.msk [vmem:[%s361_s20] sm:$0xff] %vm366_vm0, %v589_v43 }
  0xc4 PF: > { %s16_s23 = sadd.s32 1, %s810_s23   ;;  %s943_s21 = smov %s806_s22 }
  0xc5   : > { %p13_p5 = scmp.ge.s32.totalorder %s16_s23, 4   ;;  %s944_s22 = smov %s946_s24 }
  0xc7   :  { %15 = sbr.rel (!%p13_p5) target bundleno = 2 (0x2), region = 87 }

// kernel: mamba_forward.11
= control target key start
LH: loop header
LB: loop body
LE: loop exit
PB: predicated region body
PF: predicated region fallthrough
CT: control target
= control target key end

     0   :  { %vm65_vm0 = vcmask 261120   ;;  %s278_s3 = inlined_call_operand.vmem [shape: bf16[32,32], index: 3, kind: input, shape index: {}]   ;;  %s279_s0 = inlined_call_operand.vmem [shape: f32[16,32], index: 0, kind: input, shape index: {}]   ;;  %s280_s1 = inlined_call_operand.vmem [shape: bf16[32,32], index: 1, kind: input, shape index: {}]   ;;  %s281_s4 = inlined_call_operand.vmem [shape: f32[1,32], index: 4, kind: input, shape index: {}]   ;;  %s282_s2 = inlined_call_operand.vmem [shape: f32[1,32], index: 2, kind: input, shape index: {}]   ;;  %s283_s5 = inlined_call_operand.vmem [shape: f32[16,32], index: 5, kind: input, shape index: {}]   ;;  %s284_s6 = inlined_call_operand.vmem [shape: f32[16,32], index: 6, kind: output, shape index: {}]  }
   0x1   :  { %v188_v0 = vld [vmem:[%s278_s3 + $0x8] sm:$0xff]  ;;  %v24_v1 = vld [vmem:[%s279_s0] sm:$0xff] }
   0x2   :  { %v25_v2 = vld [vmem:[%s279_s0 + $0x8] sm:$0xff]  ;;  %v28_v3 = vmul.f32 0.044715, %v24_v1  ;;  %109 = vmatpush.bf16.msra.mxu1 %v188_v0  ;;  %v187_v5 = vld [vmem:[%s278_s3] sm:$0xff]  ;;  %v26_v16 = vmul.f32 0.5, %v24_v1 }
   0x3   :  { %v186_v4 = vld [vmem:[%s280_s1 + $0x8] sm:$0xff]  ;;  %v29_v6 = vmul.f32 0.044715, %v25_v2  ;;  %v185_v8 = vld [vmem:[%s280_s1] sm:$0xff]  ;;  %v27_v18 = vmul.f32 0.5, %v25_v2 }
   0x4   :  { %v30_v7 = vmul.f32 %v28_v3, %v24_v1  ;;  %75 = vmatpush.bf16.msra.mxu0 %v186_v4  ;;  %v189_v25 = vld [vmem:[%s281_s4] ss:$0 sm:$0xff] }
   0x5   :  { %v31_v9 = vmul.f32 %v29_v6, %v25_v2  ;;  %v190_v40 = vld [vmem:[%s282_s2] ss:$0 sm:$0xff] }
   0x6   :  { %v32_v10 = vmul.f32 %v30_v7, %v24_v1  ;;  %110 = vmatpush.bf16.msra.mxu1 %v187_v5  ;;  %v157_v53 = vld [vmem:[%s283_s5] sm:$0xff] }
   0x7   :  { %v33_v11 = vmul.f32 %v31_v9, %v25_v2 }
   0x8   :  { %v34_v12 = vadd.f32 %v32_v10, %v24_v1  ;;  %76 = vmatpush.bf16.msra.mxu0 %v185_v8 }
   0x9   :  { %v35_v13 = vadd.f32 %v33_v11, %v25_v2  ;;  %v158_v2 = vld [vmem:[%s283_s5 + $0x8] sm:$0xff] }
   0xa   :  { %v36_v14 = vmul.f32 0.7978846, %v34_v12 }
   0xb   :  { %v37_v15 = vmul.f32 0.7978846, %v35_v13 }
   0xc   :  { %191 = vtanh.f32 %v36_v14 }
   0xd   :  { %193 = vtanh.f32 %v37_v15 }
  0x12   :  { %v192_v17 = vpop.eup %191 }
  0x13   :  { %v194_v19 = vpop.eup %193  ;;  %v40_v20 = vadd.f32 1.0, %v192_v17 }
  0x14   :  { %v41_v21 = vadd.f32 1.0, %v194_v19 }
  0x15   :  { %v42_v22 = vmul.f32 %v40_v20, %v26_v16 }
  0x16   :  { %v43_v23 = vmul.f32 %v41_v21, %v27_v18 }
  0x18   :  { %v44_v24 = vpack.c.bf16 %v43_v23, %v42_v22 }
  0x1a   :  { %184 = vmatmul.msk.bf16.vlgmr.msra.gmra.mxu1 %vm65_vm0, %v44_v24  ;;  %175 = vmatmul.msk.bf16.vlgmr.msra.gmra.mxu0 %vm65_vm0, %v44_v24 }
  0x97   :  { %v112_v26 = vpop.f32.mrf.mxu1  ;;  %v78_v42 = vpop.f32.mrf.mxu0 }
  0x98   :  { %v113_v27 = vadd.f32 %v189_v25, %v112_v26  ;;  %v79_v46 = vadd.f32 %v190_v40, %v78_v42 }
  0x9a   :  { %v117_v28 = vsub.f32 0.0, %v113_v27 }
  0x9c   :  { %v119_v29 = vmul.f32 1.442695, %v117_v28 }
  0x9e   :  { %195 = vpow2.f32 %v119_v29 }
  0x9f   :  { %v114_v30 = vpop.f32.mrf.mxu1  ;;  %v80_v60 = vpop.f32.mrf.mxu0 }
  0xa0   :  { %v115_v31 = vadd.f32 %v189_v25, %v114_v30  ;;  %v81_v63 = vadd.f32 %v190_v40, %v80_v60 }
  0xa2   :  { %v118_v32 = vsub.f32 0.0, %v115_v31 }
  0xa4   :  { %v196_v33 = vpop.eup %195  ;;  %v121_v34 = vmul.f32 1.442695, %v118_v32 }
  0xa5   :  { %v123_v35 = vadd.f32 1.0, %v196_v33 }
  0xa6   :  { %197 = vpow2.f32 %v121_v34 }
  0xa7   :  { %199 = vrcp.f32 %v123_v35  ;;  %v136_v43 = vand.u32 2147483648, %v123_v35  ;;  %v134_v45 = vand.u32 2147483647, %v123_v35  ;;  %vm130_vm2 = vweird.f32 %v123_v35 }
  0xa9   :  { %v137_v49 = vor.u32 1.1754944e-38, %v136_v43  ;;  %vm135_vm4 = vcmp.eq.f32.partialorder %v134_v45, 8.507059e+37 }
  0xac   :  { %v198_v36 = vpop.eup %197 }
  0xad   :  { %v200_v37 = vpop.eup %199  ;;  %v124_v38 = vadd.f32 1.0, %v198_v36 }
  0xae   :  { %v126_v39 = vmul.f32 %v200_v37, %v123_v35  ;;  %vm131_vm1 = vweird.f32 %v200_v37 }
  0xaf   :  { %201 = vrcp.f32 %v124_v38  ;;  %vm132_vm3 = vmor %vm130_vm2, %vm131_vm1  ;;  %v151_v56 = vand.u32 2147483648, %v124_v38  ;;  %v149_v59 = vand.u32 2147483647, %v124_v38  ;;  %vm145_vm6 = vweird.f32 %v124_v38 }
  0xb0   :  { %v127_v41 = vsub.f32 1.0, %v126_v39 }
  0xb1   :  { %v152_v62 = vor.u32 1.1754944e-38, %v151_v56  ;;  %vm150_vm8 = vcmp.eq.f32.partialorder %v149_v59, 8.507059e+37 }
  0xb2   :  { %v128_v44 = vmul.f32 %v200_v37, %v127_v41 }
  0xb4   :  { %v129_v47 = vadd.f32 %v200_v37, %v128_v44 }
  0xb5   :  { %v202_v48 = vpop.eup %201 }
  0xb6   :  { %v133_v50 = vsel %vm132_vm3, %v200_v37, %v129_v47  ;;  %v141_v51 = vmul.f32 %v202_v48, %v124_v38  ;;  %vm146_vm5 = vweird.f32 %v202_v48 }
  0xb7   :  { %v138_v52 = vsel %vm135_vm4, %v137_v49, %v133_v50  ;;  %vm147_vm7 = vmor %vm145_vm6, %vm146_vm5 }
  0xb8   :  { %v155_v54 = vmul.f32 %v138_v52, %v79_v46  ;;  %v142_v55 = vsub.f32 1.0, %v141_v51 }
  0xba   :  { %v159_v57 = vadd.f32 %v157_v53, %v155_v54  ;;  %v143_v58 = vmul.f32 %v202_v48, %v142_v55 }
  0xbc   :  { %161 = vst.msk [vmem:[%s284_s6] sm:$0xff] %vm65_vm0, %v159_v57  ;;  %v144_v61 = vadd.f32 %v202_v48, %v143_v58 }
  0xbe   :  { %v148_v0 = vsel %vm147_vm7, %v202_v48, %v144_v61 }
  0xbf   :  { %v153_v1 = vsel %vm150_vm8, %v152_v62, %v148_v0 }
  0xc0   :  { %v156_v3 = vmul.f32 %v153_v1, %v81_v63 }
  0xc2   :  { %v160_v4 = vadd.f32 %v158_v2, %v156_v3 }
  0xc4   :  { %162 = vst.msk [vmem:[%s284_s6 + $0x8] sm:$0xff] %vm65_vm0, %v160_v4 }

// kernel: mamba_forward.15
= control target key start
LH: loop header
LB: loop body
LE: loop exit
PB: predicated region body
PF: predicated region fallthrough
CT: control target
= control target key end

     0   :  { %vm18_vm0 = vcmask 261120   ;;  %v175_v4 = vmov 8.0   ;;  %s221_s0 = inlined_call_operand.vmem [shape: f32[2,8,32], index: 0, kind: input, shape index: {}]   ;;  %s222_s1 = inlined_call_operand.vmem [shape: bf16[32,4], index: 1, kind: input, shape index: {}]   ;;  %s223_s2 = inlined_call_operand.vmem [shape: f32[1,4], index: 2, kind: input, shape index: {}]   ;;  %s224_s3 = inlined_call_operand.hbm [shape: f32[2,4], index: 3, kind: output, shape index: {}]  }
   0x1   :  { %v139_v0 = vld [vmem:[%s222_s1 + $0x8] sm:$0xff]  ;;  %v16_v1 = vld [vmem:[%s221_s0] sm:$0xff]  ;;  %143 = vrcp.f32 %v175_v4 }
   0x2   :  { %v17_v2 = vld [vmem:[%s221_s0 + $0x8] sm:$0xff]  ;;  %v19_v3 = vsel %vm18_vm0, %v16_v1, 0.0  ;;  %80 = vmatpush.bf16.msra.mxu0 %v139_v0  ;;  %v138_v5 = vld [vmem:[%s222_s1] sm:$0xff] }
   0x3   :  { %v20_v6 = vrot.slane %v19_v3, 4  ;;  %v26_v7 = vsel %vm18_vm0, %v17_v2, 0.0 }
   0x4   :  { %8 = vsyncpa [#allocation3], 0  ;;  %v27_v8 = vrot.slane %v26_v7, 4  ;;  %vm56_vm2 = vcmask 1041409   ;;  %v142_v33 = vld [vmem:[%s223_s2] ss:$0 sm:$0xff] }
   0x5   :  { %v21_v9 = vadd.f32 %v20_v6, %v19_v3  ;;  %vm87_vm3 = vcmask 25600   ;;  %s176_s2 = smov [#allocation2]   ;;  %s120_s23 = sshll.u32 %s224_s3, 4  ;;  %s121_s23 = int_to_ptr.hbm [resolvable:$true] %s120_s23 }
   0x6   :  { %v28_v10 = vadd.f32 %v27_v8, %v26_v7  ;;  %81 = vmatpush.bf16.msra.mxu0 %v138_v5  ;;  %s118_s20 = sshll.u32 %s176_s2, 4  ;;  %s119_s20 = int_to_ptr.vmem [resolvable:$true] %s118_s20 }
   0x7   :  { %v22_v11 = vrot.slane %v21_v9, 2  ;;  %v144_v12 = vpop.eup %143 }
   0x8   :  { %v29_v13 = vrot.slane %v28_v10, 2  ;;  %v34_v15 = vmul.f32 8.0, %v144_v12  ;;  %vm38_vm1 = vweird.f32 %v144_v12 }
   0x9   :  { %v23_v14 = vadd.f32 %v22_v11, %v21_v9 }
   0xa   :  { %v30_v16 = vadd.f32 %v29_v13, %v28_v10  ;;  %v35_v18 = vsub.f32 1.0, %v34_v15 }
   0xb   :  { %v24_v17 = vrot.slane %v23_v14, 1 }
   0xc   :  { %v31_v19 = vrot.slane %v30_v16, 1  ;;  %v36_v20 = vmul.f32 %v144_v12, %v35_v18 }
   0xd   :  { %v25_v21 = vadd.f32 %v24_v17, %v23_v14 }
   0xe   :  { %v32_v22 = vadd.f32 %v31_v19, %v30_v16  ;;  %v37_v23 = vadd.f32 %v144_v12, %v36_v20 }
  0x10   :  { %v39_v24 = vsel %vm38_vm1, %v144_v12, %v37_v23 }
  0x11   :  { %v40_v25 = vmul.f32 %v39_v24, %v25_v21  ;;  %v41_v26 = vmul.f32 %v39_v24, %v32_v22 }
  0x13   :  { %v42_v27 = vpack.c.bf16 %v40_v25, %v40_v25  ;;  %v43_v28 = vpack.c.bf16 %v41_v26, %v41_v26 }
  0x15   :  { %v54_v29 = vunpack.c.l.b16 %v42_v27  ;;  %v55_v30 = vunpack.c.l.b16 %v43_v28 }
  0x17   :  { %v57_v31 = vsel %vm56_vm2, %v55_v30, %v54_v29 }
  0x18   :  { %v58_v32 = vpack.c.b16 %v57_v31, %v57_v31 }
  0x1a   :  { %137 = vmatmul.msk.bf16.vlgmr.msra.gmra.mxu0 %vm18_vm0, %v58_v32 }
  0x97   :  { %v83_v34 = vpop.f32.mrf.mxu0 }
  0x98   :  { %v84_v35 = vadd.f32 %v142_v33, %v83_v34 }
  0x9a   :  { %v88_v36 = vsel %vm87_vm3, %v84_v35, -inf }
  0x9b   :  { %89 = vmax.xlane.f32.xlu0 %v88_v36 }
  0x9f   :  { %v85_v37 = vpop.f32.mrf.mxu0 }
 0x10e   :  { %v90_v38 = vpop.xlane.xlu0 %89 }
 0x10f   :  { %v91_v39 = vsub.f32 %v84_v35, %v90_v38 }
 0x111   :  { %v92_v40 = vmul.f32 1.442695, %v91_v39 }
 0x113   :  { %145 = vpow2.f32 %v92_v40 }
 0x119   :  { %v146_v41 = vpop.eup %145 }
 0x11a   :  { %v94_v42 = vsel %vm87_vm3, %v146_v41, 0.0 }
 0x11b   :  { %95 = vadd.xlane.f32.xlu0 %v94_v42 }
 0x18e   :  { %v96_v43 = vpop.xlane.xlu0 %95 }
 0x18f   :  { %147 = vrcp.f32 %v96_v43  ;;  %v108_v47 = vand.u32 2147483648, %v96_v43  ;;  %v106_v49 = vand.u32 2147483647, %v96_v43  ;;  %vm102_vm5 = vweird.f32 %v96_v43 }
 0x191   :  { %v109_v51 = vor.u32 1.1754944e-38, %v108_v47  ;;  %vm107_vm7 = vcmp.eq.f32.partialorder %v106_v49, 8.507059e+37 }
 0x195   :  { %v148_v44 = vpop.eup %147 }
 0x196   :  { %v98_v45 = vmul.f32 %v148_v44, %v96_v43  ;;  %vm103_vm4 = vweird.f32 %v148_v44 }
 0x197   :  { %vm104_vm6 = vmor %vm102_vm5, %vm103_vm4 }
 0x198   :  { %v99_v46 = vsub.f32 1.0, %v98_v45 }
 0x19a   :  { %v100_v48 = vmul.f32 %v148_v44, %v99_v46 }
 0x19c   :  { %v101_v50 = vadd.f32 %v148_v44, %v100_v48 }
 0x19e   :  { %v105_v52 = vsel %vm104_vm6, %v148_v44, %v101_v50 }
 0x19f   :  { %v110_v53 = vsel %vm107_vm7, %v109_v51, %v105_v52 }
 0x1a0   :  { %v111_v54 = vmul.f32 %v146_v41, %v110_v53 }
 0x1a2   :  { %112 = vst.msk [vmem:[#allocation2] sm:$0x3] %vm87_vm3, %v111_v54 }
 0x1a3   :  { %123 = dma.vmem_to_hbm [thread:$0]  %s119_s20, 32, %s121_s23, [#allocation3]  }
 0x1a4   :  { %173 = dma.done.wait [#allocation3], 32  }
 0x1a5   :  { %174 = vsyncadd [#allocation3], 4294967264 }
 0x1a6   :  { %128 = vsyncpa [#allocation3], 1 }

</bundles_post_ra>
